<compile_context>
chip_gen: v6e
topology: v6e:2x2x1
jax: 0.10.0
libtpu: 0.0.40
codegen_flags: <defaults>
</compile_context>

<pallas_src>
import jax
import jax.numpy as jnp
from jax import lax
from jax.experimental import pallas as pl
from jax.experimental.pallas import tpu as pltpu

# ---- hyperparameters (match the PyTorch module) ----
CONTEXT_LEN = 8
D_MODEL = 32
H = 4
D_HEAD = D_MODEL // H
N_LAYERS = 2
VOCAB_SIZE = 16          # stand-in for len(chars) of the (unavailable) dataset
VOCAB_PAD = 128          # lane-dense padded vocab width for the in-kernel store
LN_EPS = 1e-5
NEG_BIG = -1e30          # finite "-inf" for the additive causal mask


def _layer_norm(x, g, b):
    # PyTorch nn.LayerNorm: biased variance over last dim, eps=1e-5 (f32 math)
    mean = jnp.mean(x, axis=-1, keepdims=True)
    var = jnp.mean((x - mean) ** 2, axis=-1, keepdims=True)
    return (x - mean) * lax.rsqrt(var + LN_EPS) * g + b


def _split_heads(z, bb, t):
    # (bb*t, D) -> (bb*H, t, D_HEAD): heads folded into the batch axis so the
    # attention einsums stay 3-D / single-batch-dim (known-good Mosaic path).
    return z.reshape(bb, t, H, D_HEAD).transpose(0, 2, 1, 3).reshape(
        bb * H, t, D_HEAD)


def _merge_heads(z, bb, t):
    # (bb*H, t, D_HEAD) -> (bb*t, D), head-major feature concat (matches torch)
    return z.reshape(bb, H, t, D_HEAD).transpose(0, 2, 1, 3).reshape(
        bb * t, H * D_HEAD)


def gpt_decoder_kernel(x_ref, norms_ref, qkvw_ref, qkvb_ref,
                       projw_ref, smallb_ref, w1w_ref, w1b_ref, w2w_ref,
                       linw_ref, linb_ref, out_ref):
    bb, T, D = x_ref.shape
    x = x_ref[...].reshape(bb * T, D)             # (BB*T, D) f32 activations

    # additive causal mask (1, T, T): 0 where key <= query, else NEG_BIG
    row = lax.broadcasted_iota(jnp.int32, (T, T), 0)
    col = lax.broadcasted_iota(jnp.int32, (T, T), 1)
    mask_add = jnp.where(col <= row, 0.0, NEG_BIG).astype(jnp.float32)[None]

    for layer in range(N_LAYERS):
        # ---------------- multi-head self-attention (pre-LN) ----------------
        h_in = _layer_norm(x, norms_ref[2 * layer, 0], norms_ref[2 * layer, 1])
        h_bf = h_in.astype(jnp.bfloat16)
        # q/k/v split lives on a leading weight axis -> three 2-D matmuls, no
        # lane-axis slicing.  1/sqrt(d_head) is pre-folded into the Q weights.
        q = jnp.dot(h_bf, qkvw_ref[layer, 0],
                    preferred_element_type=jnp.float32) + qkvb_ref[layer, 0]
        k = jnp.dot(h_bf, qkvw_ref[layer, 1],
                    preferred_element_type=jnp.float32) + qkvb_ref[layer, 1]
        v = jnp.dot(h_bf, qkvw_ref[layer, 2],
                    preferred_element_type=jnp.float32) + qkvb_ref[layer, 2]

        qh = _split_heads(q, bb, T)               # (BB*H, T, D_HEAD) f32
        kh = _split_heads(k, bb, T)
        vh = _split_heads(v, bb, T)

        # all sequences and heads in one 3-D einsum pair
        s = jnp.einsum('bqd,bkd->bqk', qh.astype(jnp.bfloat16),
                       kh.astype(jnp.bfloat16),
                       preferred_element_type=jnp.float32)   # (BB*H, T, T)
        s = s + mask_add                                     # additive mask
        s = s - jnp.max(s, axis=-1, keepdims=True)
        p = jnp.exp(s)
        p = p * pl.reciprocal(jnp.sum(p, axis=-1, keepdims=True), approx=True)
        o = jnp.einsum('bqk,bkd->bqd', p.astype(jnp.bfloat16),
                       vh.astype(jnp.bfloat16),
                       preferred_element_type=jnp.float32)   # (BB*H, T, D_HEAD)
        attn = _merge_heads(o, bb, T)                        # (BB*T, D)

        attn = jnp.dot(attn.astype(jnp.bfloat16), projw_ref[layer],
                       preferred_element_type=jnp.float32) + smallb_ref[layer, 0]
        # TODO(synk): nn.Dropout layers are identity in eval-mode forward; no-op.
        x = x + attn

        # ---------------- position-wise feed-forward ----------------
        h_ff = _layer_norm(x, norms_ref[2 * layer + 1, 0],
                           norms_ref[2 * layer + 1, 1])
        hidden = jnp.dot(h_ff.astype(jnp.bfloat16), w1w_ref[layer],
                         preferred_element_type=jnp.float32) + w1b_ref[layer]
        hidden = jnp.maximum(hidden, 0.0)                    # ReLU (f32)
        ff = jnp.dot(hidden.astype(jnp.bfloat16), w2w_ref[layer],
                     preferred_element_type=jnp.float32) + smallb_ref[layer, 1]
        x = x + ff

    # ------ final layer norm + lane-dense (128-wide) vocab projection -------
    x = _layer_norm(x, norms_ref[2 * N_LAYERS, 0], norms_ref[2 * N_LAYERS, 1])
    logits = jnp.dot(x.astype(jnp.bfloat16), linw_ref[...],
                     preferred_element_type=jnp.float32) + linb_ref[0]
    out_ref[...] = logits.reshape(bb, T, VOCAB_PAD)


def init_params(key):
    ks = jax.random.split(key, 12)

    def nrm(k, shape, scale=0.02):
        return (scale * jax.random.normal(k, shape)).astype(jnp.float32)

    return dict(
        token_emb=nrm(ks[0], (VOCAB_SIZE, D_MODEL)),
        pos_emb=nrm(ks[1], (CONTEXT_LEN, D_MODEL)),
        ln1_g=jnp.ones((N_LAYERS, D_MODEL), jnp.float32),
        ln1_b=jnp.zeros((N_LAYERS, D_MODEL), jnp.float32),
        qkv_w=nrm(ks[2], (N_LAYERS, 3, D_MODEL, D_MODEL)),   # leading q/k/v axis
        qkv_b=nrm(ks[3], (N_LAYERS, 3, D_MODEL)),
        proj_w=nrm(ks[4], (N_LAYERS, D_MODEL, D_MODEL)),
        proj_b=nrm(ks[5], (N_LAYERS, D_MODEL)),
        ln2_g=jnp.ones((N_LAYERS, D_MODEL), jnp.float32),
        ln2_b=jnp.zeros((N_LAYERS, D_MODEL), jnp.float32),
        w1_w=nrm(ks[6], (N_LAYERS, D_MODEL, 4 * D_MODEL)),
        w1_b=nrm(ks[7], (N_LAYERS, 4 * D_MODEL)),
        w2_w=nrm(ks[8], (N_LAYERS, 4 * D_MODEL, D_MODEL)),
        w2_b=nrm(ks[9], (N_LAYERS, D_MODEL)),
        lnf_g=jnp.ones((1, D_MODEL), jnp.float32),
        lnf_b=jnp.zeros((1, D_MODEL), jnp.float32),
        lin_w=nrm(ks[10], (D_MODEL, VOCAB_SIZE)),
        lin_b=nrm(ks[11], (VOCAB_SIZE,)),
    )


def _full_block_spec(arr):
    # whole-array block, constant block index -> stays resident across grid steps
    nd = arr.ndim
    return pl.BlockSpec(arr.shape, lambda i, _nd=nd: (0,) * _nd)


def gpt_forward(params, seq, block_batch=None, slice_logits=True):
    b, t = seq.shape
    # embedding gathers (glue, plain JAX)
    x = params['token_emb'][seq] + params['pos_emb'][jnp.arange(t)][None, :, :]
    x = x.astype(jnp.float32)

    # ---- block-batch choice ----
    # BB sequences per grid step so matmul M = BB*T; keep >=2 grid steps so the
    # "parallel" axis shards across both v7x TensorCores.  VMEM budget at
    # BB<=128: in block 128*8*32*4 B = 128 KiB, out block 128*8*128*4 B =
    # 512 KiB (x2 double-buffered) + small intermediates -> well under the
    # 32 MiB default scoped-VMEM limit (and v7x's 64 MiB physical VMEM).
    if block_batch is None:
        block_batch = max(1, min(128, pl.cdiv(b, 2)))
    bb = max(1, min(block_batch, b))
    nb = pl.cdiv(b, bb)
    b_pad = nb * bb
    if b_pad != b:
        x = jnp.pad(x, ((0, b_pad - b), (0, 0), (0, 0)))

    # ---- weight prep (packing + bf16 cast for MXU operands) ----
    # fold 1/sqrt(d_head) into the Q block of the qkv projection
    scale = 1.0 / (D_HEAD ** 0.5)
    qkv_w = params['qkv_w'].at[:, 0].multiply(scale).astype(jnp.bfloat16)
    qkv_b = params['qkv_b'].at[:, 0].multiply(scale)            # f32 bias

    # stacked LayerNorm params: rows [2l]=ln1, [2l+1]=ln2, [2N]=final LN
    norm_rows = []
    for l in range(N_LAYERS):
        norm_rows.append(jnp.stack([params['ln1_g'][l], params['ln1_b'][l]]))
        norm_rows.append(jnp.stack([params['ln2_g'][l], params['ln2_b'][l]]))
    norm_rows.append(jnp.stack([params['lnf_g'][0], params['lnf_b'][0]]))
    norms = jnp.stack(norm_rows)                                # (2N+1, 2, D)

    small_b = jnp.stack([params['proj_b'], params['w2_b']], axis=1)  # (N, 2, D)

    proj_w = params['proj_w'].astype(jnp.bfloat16)
    w1_w = params['w1_w'].astype(jnp.bfloat16)
    w2_w = params['w2_w'].astype(jnp.bfloat16)

    # lane-dense (128-wide) vocab projection
    lin_w = jnp.zeros((D_MODEL, VOCAB_PAD), jnp.float32).at[:, :VOCAB_SIZE].set(
        params['lin_w']).astype(jnp.bfloat16)
    lin_b = jnp.zeros((1, VOCAB_PAD), jnp.float32).at[0, :VOCAB_SIZE].set(
        params['lin_b'])

    weights = (norms, qkv_w, qkv_b, proj_w, small_b,
               w1_w, params['w1_b'], w2_w, lin_w, lin_b)

    in_specs = ([pl.BlockSpec((bb, t, D_MODEL), lambda i: (i, 0, 0))]
                + [_full_block_spec(w) for w in weights])
    out_spec = pl.BlockSpec((bb, t, VOCAB_PAD), lambda i: (i, 0, 0))

    logits_pad = pl.pallas_call(
        gpt_decoder_kernel,
        out_shape=jax.ShapeDtypeStruct((b_pad, t, VOCAB_PAD), jnp.float32),
        grid=(nb,),                       # BB sequences per grid step
        in_specs=in_specs,
        out_specs=out_spec,
        compiler_params=pltpu.CompilerParams(
            dimension_semantics=("parallel",)),
    )(x, *weights)

    if slice_logits:
        return logits_pad[:b, :, :VOCAB_SIZE]
    # padded-vocab layout (no extra HBM copy) for consumers that can take it
    return logits_pad[:b]


if __name__ == "__main__":
    key = jax.random.PRNGKey(0)
    pkey, skey = jax.random.split(key)
    params = init_params(pkey)
    seq = jax.random.randint(skey, (2, CONTEXT_LEN), 0, VOCAB_SIZE,
                             dtype=jnp.int32)

    logits = jax.jit(gpt_forward)(params, seq)
    logits = jax.block_until_ready(logits)

    assert logits.shape == (2, CONTEXT_LEN, VOCAB_SIZE), logits.shape
    assert bool(jnp.all(jnp.isfinite(logits)))
    print("KERNEL_OK")
</pallas_src>

<mosaic_0001>
module attributes {stable_mosaic.version = 11 : i64} {
  func.func @gpt_decoder_kernel(%arg0: i32, %arg1: memref<1x8x32xf32, #tpu.memory_space<vmem>>, %arg2: memref<5x2x32xf32, #tpu.memory_space<vmem>>, %arg3: memref<2x3x32x32xbf16, #tpu.memory_space<vmem>>, %arg4: memref<2x3x32xf32, #tpu.memory_space<vmem>>, %arg5: memref<2x32x32xbf16, #tpu.memory_space<vmem>>, %arg6: memref<2x2x32xf32, #tpu.memory_space<vmem>>, %arg7: memref<2x32x128xbf16, #tpu.memory_space<vmem>>, %arg8: memref<2x128xf32, #tpu.memory_space<vmem>>, %arg9: memref<2x128x32xbf16, #tpu.memory_space<vmem>>, %arg10: memref<32x128xbf16, #tpu.memory_space<vmem>>, %arg11: memref<1x128xf32, #tpu.memory_space<vmem>>, %arg12: memref<1x8x128xf32, #tpu.memory_space<vmem>>) attributes {dimension_semantics = [#tpu.dimension_semantics<parallel>], iteration_bounds = array<i64: 2>, scalar_prefetch = 0 : i64, scratch_operands = 0 : i64, tpu.core_type = #tpu.core_type<tc>, window_params = [{transform_indices = @transform_0, window_bounds = array<i64: 1, 8, 32>}, {pipeline_mode = #tpu.pipeline_mode<synchronous>, transform_indices = @transform_1, window_bounds = array<i64: 5, 2, 32>}, {pipeline_mode = #tpu.pipeline_mode<synchronous>, transform_indices = @transform_2, window_bounds = array<i64: 2, 3, 32, 32>}, {pipeline_mode = #tpu.pipeline_mode<synchronous>, transform_indices = @transform_3, window_bounds = array<i64: 2, 3, 32>}, {pipeline_mode = #tpu.pipeline_mode<synchronous>, transform_indices = @transform_4, window_bounds = array<i64: 2, 32, 32>}, {pipeline_mode = #tpu.pipeline_mode<synchronous>, transform_indices = @transform_5, window_bounds = array<i64: 2, 2, 32>}, {pipeline_mode = #tpu.pipeline_mode<synchronous>, transform_indices = @transform_6, window_bounds = array<i64: 2, 32, 128>}, {pipeline_mode = #tpu.pipeline_mode<synchronous>, transform_indices = @transform_7, window_bounds = array<i64: 2, 128>}, {pipeline_mode = #tpu.pipeline_mode<synchronous>, transform_indices = @transform_8, window_bounds = array<i64: 2, 128, 32>}, {pipeline_mode = #tpu.pipeline_mode<synchronous>, transform_indices = @transform_9, window_bounds = array<i64: 32, 128>}, {pipeline_mode = #tpu.pipeline_mode<synchronous>, transform_indices = @transform_10, window_bounds = array<i64: 1, 128>}, {transform_indices = @transform_11, window_bounds = array<i64: 1, 8, 128>}]} {
    %c0 = arith.constant 0 : index
    %c0_0 = arith.constant 0 : index
    %c0_1 = arith.constant 0 : index
    %0 = vector.load %arg1[%c0, %c0_0, %c0_1] : memref<1x8x32xf32, #tpu.memory_space<vmem>>, vector<1x8x32xf32>
    %1 = vector.shape_cast %0 : vector<1x8x32xf32> to vector<8x32xf32>
    %2 = tpu.iota {dimensions = array<i32: 0>} : vector<8x8xi32>
    %3 = tpu.iota {dimensions = array<i32: 1>} : vector<8x8xi32>
    %4 = arith.cmpi sle, %3, %2 : vector<8x8xi32>
    %cst = arith.constant 0.000000e+00 : f32
    %cst_2 = arith.constant -1.000000e+30 : f32
    %5 = vector.broadcast %cst : f32 to vector<8x8xf32>
    %6 = vector.broadcast %cst_2 : f32 to vector<8x8xf32>
    %7 = arith.select %4, %5, %6 : vector<8x8xi1>, vector<8x8xf32>
    %8 = vector.shape_cast %7 : vector<8x8xf32> to vector<1x8x8xf32>
    %c0_3 = arith.constant 0 : index
    %c0_4 = arith.constant 0 : index
    %c0_5 = arith.constant 0 : index
    %9 = vector.load %arg2[%c0_3, %c0_4, %c0_5] : memref<5x2x32xf32, #tpu.memory_space<vmem>>, vector<1x1x32xf32>
    %10 = vector.shape_cast %9 : vector<1x1x32xf32> to vector<32xf32>
    %c0_6 = arith.constant 0 : index
    %c1 = arith.constant 1 : index
    %c0_7 = arith.constant 0 : index
    %11 = vector.load %arg2[%c0_6, %c1, %c0_7] : memref<5x2x32xf32, #tpu.memory_space<vmem>>, vector<1x1x32xf32>
    %12 = vector.shape_cast %11 : vector<1x1x32xf32> to vector<32xf32>
    %cst_8 = arith.constant dense<0.000000e+00> : vector<8xf32>
    %13 = vector.multi_reduction <add>, %1, %cst_8 [1] : vector<8x32xf32> to vector<8xf32>
    %14 = vector.shape_cast %13 : vector<8xf32> to vector<8x1xf32>
    %cst_9 = arith.constant 3.200000e+01 : f32
    %15 = vector.broadcast %cst_9 : f32 to vector<8x1xf32>
    %16 = arith.divf %14, %15 : vector<8x1xf32>
    %17 = vector.broadcast %16 : vector<8x1xf32> to vector<8x32xf32>
    %18 = arith.subf %1, %17 : vector<8x32xf32>
    %19 = arith.mulf %18, %18 : vector<8x32xf32>
    %cst_10 = arith.constant dense<0.000000e+00> : vector<8xf32>
    %20 = vector.multi_reduction <add>, %19, %cst_10 [1] : vector<8x32xf32> to vector<8xf32>
    %21 = vector.shape_cast %20 : vector<8xf32> to vector<8x1xf32>
    %cst_11 = arith.constant 3.200000e+01 : f32
    %22 = vector.broadcast %cst_11 : f32 to vector<8x1xf32>
    %23 = arith.divf %21, %22 : vector<8x1xf32>
    %24 = vector.broadcast %16 : vector<8x1xf32> to vector<8x32xf32>
    %25 = arith.subf %1, %24 : vector<8x32xf32>
    %cst_12 = arith.constant 9.99999974E-6 : f32
    %26 = vector.broadcast %cst_12 : f32 to vector<8x1xf32>
    %27 = arith.addf %23, %26 : vector<8x1xf32>
    %28 = math.rsqrt %27 : vector<8x1xf32>
    %29 = vector.broadcast %28 : vector<8x1xf32> to vector<8x32xf32>
    %30 = arith.mulf %25, %29 : vector<8x32xf32>
    %31 = vector.shape_cast %10 : vector<32xf32> to vector<1x32xf32>
    %32 = vector.broadcast %31 : vector<1x32xf32> to vector<8x32xf32>
    %33 = arith.mulf %30, %32 : vector<8x32xf32>
    %34 = vector.shape_cast %12 : vector<32xf32> to vector<1x32xf32>
    %35 = vector.broadcast %34 : vector<1x32xf32> to vector<8x32xf32>
    %36 = arith.addf %33, %35 : vector<8x32xf32>
    %37 = arith.truncf %36 : vector<8x32xf32> to vector<8x32xbf16>
    %c0_13 = arith.constant 0 : index
    %c0_14 = arith.constant 0 : index
    %c0_15 = arith.constant 0 : index
    %c0_16 = arith.constant 0 : index
    %38 = vector.load %arg3[%c0_13, %c0_14, %c0_15, %c0_16] : memref<2x3x32x32xbf16, #tpu.memory_space<vmem>>, vector<1x1x32x32xbf16>
    %39 = vector.shape_cast %38 : vector<1x1x32x32xbf16> to vector<32x32xbf16>
    %cst_17 = arith.constant dense<0.000000e+00> : vector<8x32xf32>
    %40 = tpu.matmul %37, %39, %cst_17 {dimension_numbers = #tpu.dot_dimension_numbers<[1], [0], [0], [1], [0, 0, 1, 1], [], []>} : vector<8x32xbf16>, vector<32x32xbf16>, vector<8x32xf32> -> vector<8x32xf32>
    %c0_18 = arith.constant 0 : index
    %c0_19 = arith.constant 0 : index
    %c0_20 = arith.constant 0 : index
    %41 = vector.load %arg4[%c0_18, %c0_19, %c0_20] : memref<2x3x32xf32, #tpu.memory_space<vmem>>, vector<1x1x32xf32>
    %42 = vector.shape_cast %41 : vector<1x1x32xf32> to vector<32xf32>
    %43 = vector.shape_cast %42 : vector<32xf32> to vector<1x32xf32>
    %44 = vector.broadcast %43 : vector<1x32xf32> to vector<8x32xf32>
    %45 = arith.addf %40, %44 : vector<8x32xf32>
    %c0_21 = arith.constant 0 : index
    %c1_22 = arith.constant 1 : index
    %c0_23 = arith.constant 0 : index
    %c0_24 = arith.constant 0 : index
    %46 = vector.load %arg3[%c0_21, %c1_22, %c0_23, %c0_24] : memref<2x3x32x32xbf16, #tpu.memory_space<vmem>>, vector<1x1x32x32xbf16>
    %47 = vector.shape_cast %46 : vector<1x1x32x32xbf16> to vector<32x32xbf16>
    %cst_25 = arith.constant dense<0.000000e+00> : vector<8x32xf32>
    %48 = tpu.matmul %37, %47, %cst_25 {dimension_numbers = #tpu.dot_dimension_numbers<[1], [0], [0], [1], [0, 0, 1, 1], [], []>} : vector<8x32xbf16>, vector<32x32xbf16>, vector<8x32xf32> -> vector<8x32xf32>
    %c0_26 = arith.constant 0 : index
    %c1_27 = arith.constant 1 : index
    %c0_28 = arith.constant 0 : index
    %49 = vector.load %arg4[%c0_26, %c1_27, %c0_28] : memref<2x3x32xf32, #tpu.memory_space<vmem>>, vector<1x1x32xf32>
    %50 = vector.shape_cast %49 : vector<1x1x32xf32> to vector<32xf32>
    %51 = vector.shape_cast %50 : vector<32xf32> to vector<1x32xf32>
    %52 = vector.broadcast %51 : vector<1x32xf32> to vector<8x32xf32>
    %53 = arith.addf %48, %52 : vector<8x32xf32>
    %c0_29 = arith.constant 0 : index
    %c2 = arith.constant 2 : index
    %c0_30 = arith.constant 0 : index
    %c0_31 = arith.constant 0 : index
    %54 = vector.load %arg3[%c0_29, %c2, %c0_30, %c0_31] : memref<2x3x32x32xbf16, #tpu.memory_space<vmem>>, vector<1x1x32x32xbf16>
    %55 = vector.shape_cast %54 : vector<1x1x32x32xbf16> to vector<32x32xbf16>
    %cst_32 = arith.constant dense<0.000000e+00> : vector<8x32xf32>
    %56 = tpu.matmul %37, %55, %cst_32 {dimension_numbers = #tpu.dot_dimension_numbers<[1], [0], [0], [1], [0, 0, 1, 1], [], []>} : vector<8x32xbf16>, vector<32x32xbf16>, vector<8x32xf32> -> vector<8x32xf32>
    %c0_33 = arith.constant 0 : index
    %c2_34 = arith.constant 2 : index
    %c0_35 = arith.constant 0 : index
    %57 = vector.load %arg4[%c0_33, %c2_34, %c0_35] : memref<2x3x32xf32, #tpu.memory_space<vmem>>, vector<1x1x32xf32>
    %58 = vector.shape_cast %57 : vector<1x1x32xf32> to vector<32xf32>
    %59 = vector.shape_cast %58 : vector<32xf32> to vector<1x32xf32>
    %60 = vector.broadcast %59 : vector<1x32xf32> to vector<8x32xf32>
    %61 = arith.addf %56, %60 : vector<8x32xf32>
    %62 = vector.shape_cast %45 : vector<8x32xf32> to vector<1x8x4x8xf32>
    %63 = tpu.transpose %62, [0, 2, 1, 3] : vector<1x8x4x8xf32> -> vector<1x4x8x8xf32>
    %64 = vector.shape_cast %63 : vector<1x4x8x8xf32> to vector<4x8x8xf32>
    %65 = vector.shape_cast %53 : vector<8x32xf32> to vector<1x8x4x8xf32>
    %66 = tpu.transpose %65, [0, 2, 1, 3] : vector<1x8x4x8xf32> -> vector<1x4x8x8xf32>
    %67 = vector.shape_cast %66 : vector<1x4x8x8xf32> to vector<4x8x8xf32>
    %68 = vector.shape_cast %61 : vector<8x32xf32> to vector<1x8x4x8xf32>
    %69 = tpu.transpose %68, [0, 2, 1, 3] : vector<1x8x4x8xf32> -> vector<1x4x8x8xf32>
    %70 = vector.shape_cast %69 : vector<1x4x8x8xf32> to vector<4x8x8xf32>
    %71 = arith.truncf %64 : vector<4x8x8xf32> to vector<4x8x8xbf16>
    %72 = arith.truncf %67 : vector<4x8x8xf32> to vector<4x8x8xbf16>
    "tpu.trace_start"() <{level = 10 : i32, message = "bqd,bkd->bqk"}> : () -> ()
    %cst_36 = arith.constant dense<0.000000e+00> : vector<4x8x8xf32>
    %73 = tpu.matmul %71, %72, %cst_36 {dimension_numbers = #tpu.dot_dimension_numbers<[2], [2], [1], [1], [0, 0, 0, 1, 1, 1], [0], [0]>} : vector<4x8x8xbf16>, vector<4x8x8xbf16>, vector<4x8x8xf32> -> vector<4x8x8xf32>
    "tpu.trace_stop"() : () -> ()
    %74 = vector.broadcast %8 : vector<1x8x8xf32> to vector<4x8x8xf32>
    %75 = arith.addf %73, %74 : vector<4x8x8xf32>
    %cst_37 = arith.constant dense<0xFF800000> : vector<4x8xf32>
    %76 = vector.multi_reduction <maximumf>, %75, %cst_37 [2] : vector<4x8x8xf32> to vector<4x8xf32>
    %77 = vector.shape_cast %76 : vector<4x8xf32> to vector<4x8x1xf32>
    %78 = vector.broadcast %77 : vector<4x8x1xf32> to vector<4x8x8xf32>
    %79 = arith.subf %75, %78 : vector<4x8x8xf32>
    %80 = math.exp %79 : vector<4x8x8xf32>
    %cst_38 = arith.constant dense<0.000000e+00> : vector<4x8xf32>
    %81 = vector.multi_reduction <add>, %80, %cst_38 [2] : vector<4x8x8xf32> to vector<4x8xf32>
    %82 = vector.shape_cast %81 : vector<4x8xf32> to vector<4x8x1xf32>
    %83 = tpu.reciprocal %82 {approx = true} : vector<4x8x1xf32> -> vector<4x8x1xf32>
    %84 = vector.broadcast %83 : vector<4x8x1xf32> to vector<4x8x8xf32>
    %85 = arith.mulf %80, %84 : vector<4x8x8xf32>
    %86 = arith.truncf %85 : vector<4x8x8xf32> to vector<4x8x8xbf16>
    %87 = arith.truncf %70 : vector<4x8x8xf32> to vector<4x8x8xbf16>
    "tpu.trace_start"() <{level = 10 : i32, message = "bqk,bkd->bqd"}> : () -> ()
    %cst_39 = arith.constant dense<0.000000e+00> : vector<4x8x8xf32>
    %88 = tpu.matmul %86, %87, %cst_39 {dimension_numbers = #tpu.dot_dimension_numbers<[2], [1], [1], [2], [0, 0, 0, 1, 1, 2], [0], [0]>} : vector<4x8x8xbf16>, vector<4x8x8xbf16>, vector<4x8x8xf32> -> vector<4x8x8xf32>
    "tpu.trace_stop"() : () -> ()
    %89 = vector.shape_cast %88 : vector<4x8x8xf32> to vector<1x4x8x8xf32>
    %90 = tpu.transpose %89, [0, 2, 1, 3] : vector<1x4x8x8xf32> -> vector<1x8x4x8xf32>
    %91 = vector.shape_cast %90 : vector<1x8x4x8xf32> to vector<8x32xf32>
    %92 = arith.truncf %91 : vector<8x32xf32> to vector<8x32xbf16>
    %c0_40 = arith.constant 0 : index
    %c0_41 = arith.constant 0 : index
    %c0_42 = arith.constant 0 : index
    %93 = vector.load %arg5[%c0_40, %c0_41, %c0_42] : memref<2x32x32xbf16, #tpu.memory_space<vmem>>, vector<1x32x32xbf16>
    %94 = vector.shape_cast %93 : vector<1x32x32xbf16> to vector<32x32xbf16>
    %cst_43 = arith.constant dense<0.000000e+00> : vector<8x32xf32>
    %95 = tpu.matmul %92, %94, %cst_43 {dimension_numbers = #tpu.dot_dimension_numbers<[1], [0], [0], [1], [0, 0, 1, 1], [], []>} : vector<8x32xbf16>, vector<32x32xbf16>, vector<8x32xf32> -> vector<8x32xf32>
    %c0_44 = arith.constant 0 : index
    %c0_45 = arith.constant 0 : index
    %c0_46 = arith.constant 0 : index
    %96 = vector.load %arg6[%c0_44, %c0_45, %c0_46] : memref<2x2x32xf32, #tpu.memory_space<vmem>>, vector<1x1x32xf32>
    %97 = vector.shape_cast %96 : vector<1x1x32xf32> to vector<32xf32>
    %98 = vector.shape_cast %97 : vector<32xf32> to vector<1x32xf32>
    %99 = vector.broadcast %98 : vector<1x32xf32> to vector<8x32xf32>
    %100 = arith.addf %95, %99 : vector<8x32xf32>
    %101 = arith.addf %1, %100 : vector<8x32xf32>
    %c1_47 = arith.constant 1 : index
    %c0_48 = arith.constant 0 : index
    %c0_49 = arith.constant 0 : index
    %102 = vector.load %arg2[%c1_47, %c0_48, %c0_49] : memref<5x2x32xf32, #tpu.memory_space<vmem>>, vector<1x1x32xf32>
    %103 = vector.shape_cast %102 : vector<1x1x32xf32> to vector<32xf32>
    %c1_50 = arith.constant 1 : index
    %c1_51 = arith.constant 1 : index
    %c0_52 = arith.constant 0 : index
    %104 = vector.load %arg2[%c1_50, %c1_51, %c0_52] : memref<5x2x32xf32, #tpu.memory_space<vmem>>, vector<1x1x32xf32>
    %105 = vector.shape_cast %104 : vector<1x1x32xf32> to vector<32xf32>
    %cst_53 = arith.constant dense<0.000000e+00> : vector<8xf32>
    %106 = vector.multi_reduction <add>, %101, %cst_53 [1] : vector<8x32xf32> to vector<8xf32>
    %107 = vector.shape_cast %106 : vector<8xf32> to vector<8x1xf32>
    %cst_54 = arith.constant 3.200000e+01 : f32
    %108 = vector.broadcast %cst_54 : f32 to vector<8x1xf32>
    %109 = arith.divf %107, %108 : vector<8x1xf32>
    %110 = vector.broadcast %109 : vector<8x1xf32> to vector<8x32xf32>
    %111 = arith.subf %101, %110 : vector<8x32xf32>
    %112 = arith.mulf %111, %111 : vector<8x32xf32>
    %cst_55 = arith.constant dense<0.000000e+00> : vector<8xf32>
    %113 = vector.multi_reduction <add>, %112, %cst_55 [1] : vector<8x32xf32> to vector<8xf32>
    %114 = vector.shape_cast %113 : vector<8xf32> to vector<8x1xf32>
    %cst_56 = arith.constant 3.200000e+01 : f32
    %115 = vector.broadcast %cst_56 : f32 to vector<8x1xf32>
    %116 = arith.divf %114, %115 : vector<8x1xf32>
    %117 = vector.broadcast %109 : vector<8x1xf32> to vector<8x32xf32>
    %118 = arith.subf %101, %117 : vector<8x32xf32>
    %cst_57 = arith.constant 9.99999974E-6 : f32
    %119 = vector.broadcast %cst_57 : f32 to vector<8x1xf32>
    %120 = arith.addf %116, %119 : vector<8x1xf32>
    %121 = math.rsqrt %120 : vector<8x1xf32>
    %122 = vector.broadcast %121 : vector<8x1xf32> to vector<8x32xf32>
    %123 = arith.mulf %118, %122 : vector<8x32xf32>
    %124 = vector.shape_cast %103 : vector<32xf32> to vector<1x32xf32>
    %125 = vector.broadcast %124 : vector<1x32xf32> to vector<8x32xf32>
    %126 = arith.mulf %123, %125 : vector<8x32xf32>
    %127 = vector.shape_cast %105 : vector<32xf32> to vector<1x32xf32>
    %128 = vector.broadcast %127 : vector<1x32xf32> to vector<8x32xf32>
    %129 = arith.addf %126, %128 : vector<8x32xf32>
    %130 = arith.truncf %129 : vector<8x32xf32> to vector<8x32xbf16>
    %c0_58 = arith.constant 0 : index
    %c0_59 = arith.constant 0 : index
    %c0_60 = arith.constant 0 : index
    %131 = vector.load %arg7[%c0_58, %c0_59, %c0_60] : memref<2x32x128xbf16, #tpu.memory_space<vmem>>, vector<1x32x128xbf16>
    %132 = vector.shape_cast %131 : vector<1x32x128xbf16> to vector<32x128xbf16>
    %cst_61 = arith.constant dense<0.000000e+00> : vector<8x128xf32>
    %133 = tpu.matmul %130, %132, %cst_61 {dimension_numbers = #tpu.dot_dimension_numbers<[1], [0], [0], [1], [0, 0, 1, 1], [], []>} : vector<8x32xbf16>, vector<32x128xbf16>, vector<8x128xf32> -> vector<8x128xf32>
    %c0_62 = arith.constant 0 : index
    %c0_63 = arith.constant 0 : index
    %134 = vector.load %arg8[%c0_62, %c0_63] : memref<2x128xf32, #tpu.memory_space<vmem>>, vector<1x128xf32>
    %135 = vector.shape_cast %134 : vector<1x128xf32> to vector<128xf32>
    %136 = vector.shape_cast %135 : vector<128xf32> to vector<1x128xf32>
    %137 = vector.broadcast %136 : vector<1x128xf32> to vector<8x128xf32>
    %138 = arith.addf %133, %137 : vector<8x128xf32>
    %cst_64 = arith.constant 0.000000e+00 : f32
    %139 = vector.broadcast %cst_64 : f32 to vector<8x128xf32>
    %140 = arith.maximumf %138, %139 : vector<8x128xf32>
    %141 = arith.truncf %140 : vector<8x128xf32> to vector<8x128xbf16>
    %c0_65 = arith.constant 0 : index
    %c0_66 = arith.constant 0 : index
    %c0_67 = arith.constant 0 : index
    %142 = vector.load %arg9[%c0_65, %c0_66, %c0_67] : memref<2x128x32xbf16, #tpu.memory_space<vmem>>, vector<1x128x32xbf16>
    %143 = vector.shape_cast %142 : vector<1x128x32xbf16> to vector<128x32xbf16>
    %cst_68 = arith.constant dense<0.000000e+00> : vector<8x32xf32>
    %144 = tpu.matmul %141, %143, %cst_68 {dimension_numbers = #tpu.dot_dimension_numbers<[1], [0], [0], [1], [0, 0, 1, 1], [], []>} : vector<8x128xbf16>, vector<128x32xbf16>, vector<8x32xf32> -> vector<8x32xf32>
    %c0_69 = arith.constant 0 : index
    %c1_70 = arith.constant 1 : index
    %c0_71 = arith.constant 0 : index
    %145 = vector.load %arg6[%c0_69, %c1_70, %c0_71] : memref<2x2x32xf32, #tpu.memory_space<vmem>>, vector<1x1x32xf32>
    %146 = vector.shape_cast %145 : vector<1x1x32xf32> to vector<32xf32>
    %147 = vector.shape_cast %146 : vector<32xf32> to vector<1x32xf32>
    %148 = vector.broadcast %147 : vector<1x32xf32> to vector<8x32xf32>
    %149 = arith.addf %144, %148 : vector<8x32xf32>
    %150 = arith.addf %101, %149 : vector<8x32xf32>
    %c2_72 = arith.constant 2 : index
    %c0_73 = arith.constant 0 : index
    %c0_74 = arith.constant 0 : index
    %151 = vector.load %arg2[%c2_72, %c0_73, %c0_74] : memref<5x2x32xf32, #tpu.memory_space<vmem>>, vector<1x1x32xf32>
    %152 = vector.shape_cast %151 : vector<1x1x32xf32> to vector<32xf32>
    %c2_75 = arith.constant 2 : index
    %c1_76 = arith.constant 1 : index
    %c0_77 = arith.constant 0 : index
    %153 = vector.load %arg2[%c2_75, %c1_76, %c0_77] : memref<5x2x32xf32, #tpu.memory_space<vmem>>, vector<1x1x32xf32>
    %154 = vector.shape_cast %153 : vector<1x1x32xf32> to vector<32xf32>
    %cst_78 = arith.constant dense<0.000000e+00> : vector<8xf32>
    %155 = vector.multi_reduction <add>, %150, %cst_78 [1] : vector<8x32xf32> to vector<8xf32>
    %156 = vector.shape_cast %155 : vector<8xf32> to vector<8x1xf32>
    %cst_79 = arith.constant 3.200000e+01 : f32
    %157 = vector.broadcast %cst_79 : f32 to vector<8x1xf32>
    %158 = arith.divf %156, %157 : vector<8x1xf32>
    %159 = vector.broadcast %158 : vector<8x1xf32> to vector<8x32xf32>
    %160 = arith.subf %150, %159 : vector<8x32xf32>
    %161 = arith.mulf %160, %160 : vector<8x32xf32>
    %cst_80 = arith.constant dense<0.000000e+00> : vector<8xf32>
    %162 = vector.multi_reduction <add>, %161, %cst_80 [1] : vector<8x32xf32> to vector<8xf32>
    %163 = vector.shape_cast %162 : vector<8xf32> to vector<8x1xf32>
    %cst_81 = arith.constant 3.200000e+01 : f32
    %164 = vector.broadcast %cst_81 : f32 to vector<8x1xf32>
    %165 = arith.divf %163, %164 : vector<8x1xf32>
    %166 = vector.broadcast %158 : vector<8x1xf32> to vector<8x32xf32>
    %167 = arith.subf %150, %166 : vector<8x32xf32>
    %cst_82 = arith.constant 9.99999974E-6 : f32
    %168 = vector.broadcast %cst_82 : f32 to vector<8x1xf32>
    %169 = arith.addf %165, %168 : vector<8x1xf32>
    %170 = math.rsqrt %169 : vector<8x1xf32>
    %171 = vector.broadcast %170 : vector<8x1xf32> to vector<8x32xf32>
    %172 = arith.mulf %167, %171 : vector<8x32xf32>
    %173 = vector.shape_cast %152 : vector<32xf32> to vector<1x32xf32>
    %174 = vector.broadcast %173 : vector<1x32xf32> to vector<8x32xf32>
    %175 = arith.mulf %172, %174 : vector<8x32xf32>
    %176 = vector.shape_cast %154 : vector<32xf32> to vector<1x32xf32>
    %177 = vector.broadcast %176 : vector<1x32xf32> to vector<8x32xf32>
    %178 = arith.addf %175, %177 : vector<8x32xf32>
    %179 = arith.truncf %178 : vector<8x32xf32> to vector<8x32xbf16>
    %c1_83 = arith.constant 1 : index
    %c0_84 = arith.constant 0 : index
    %c0_85 = arith.constant 0 : index
    %c0_86 = arith.constant 0 : index
    %180 = vector.load %arg3[%c1_83, %c0_84, %c0_85, %c0_86] : memref<2x3x32x32xbf16, #tpu.memory_space<vmem>>, vector<1x1x32x32xbf16>
    %181 = vector.shape_cast %180 : vector<1x1x32x32xbf16> to vector<32x32xbf16>
    %cst_87 = arith.constant dense<0.000000e+00> : vector<8x32xf32>
    %182 = tpu.matmul %179, %181, %cst_87 {dimension_numbers = #tpu.dot_dimension_numbers<[1], [0], [0], [1], [0, 0, 1, 1], [], []>} : vector<8x32xbf16>, vector<32x32xbf16>, vector<8x32xf32> -> vector<8x32xf32>
    %c1_88 = arith.constant 1 : index
    %c0_89 = arith.constant 0 : index
    %c0_90 = arith.constant 0 : index
    %183 = vector.load %arg4[%c1_88, %c0_89, %c0_90] : memref<2x3x32xf32, #tpu.memory_space<vmem>>, vector<1x1x32xf32>
    %184 = vector.shape_cast %183 : vector<1x1x32xf32> to vector<32xf32>
    %185 = vector.shape_cast %184 : vector<32xf32> to vector<1x32xf32>
    %186 = vector.broadcast %185 : vector<1x32xf32> to vector<8x32xf32>
    %187 = arith.addf %182, %186 : vector<8x32xf32>
    %c1_91 = arith.constant 1 : index
    %c1_92 = arith.constant 1 : index
    %c0_93 = arith.constant 0 : index
    %c0_94 = arith.constant 0 : index
    %188 = vector.load %arg3[%c1_91, %c1_92, %c0_93, %c0_94] : memref<2x3x32x32xbf16, #tpu.memory_space<vmem>>, vector<1x1x32x32xbf16>
    %189 = vector.shape_cast %188 : vector<1x1x32x32xbf16> to vector<32x32xbf16>
    %cst_95 = arith.constant dense<0.000000e+00> : vector<8x32xf32>
    %190 = tpu.matmul %179, %189, %cst_95 {dimension_numbers = #tpu.dot_dimension_numbers<[1], [0], [0], [1], [0, 0, 1, 1], [], []>} : vector<8x32xbf16>, vector<32x32xbf16>, vector<8x32xf32> -> vector<8x32xf32>
    %c1_96 = arith.constant 1 : index
    %c1_97 = arith.constant 1 : index
    %c0_98 = arith.constant 0 : index
    %191 = vector.load %arg4[%c1_96, %c1_97, %c0_98] : memref<2x3x32xf32, #tpu.memory_space<vmem>>, vector<1x1x32xf32>
    %192 = vector.shape_cast %191 : vector<1x1x32xf32> to vector<32xf32>
    %193 = vector.shape_cast %192 : vector<32xf32> to vector<1x32xf32>
    %194 = vector.broadcast %193 : vector<1x32xf32> to vector<8x32xf32>
    %195 = arith.addf %190, %194 : vector<8x32xf32>
    %c1_99 = arith.constant 1 : index
    %c2_100 = arith.constant 2 : index
    %c0_101 = arith.constant 0 : index
    %c0_102 = arith.constant 0 : index
    %196 = vector.load %arg3[%c1_99, %c2_100, %c0_101, %c0_102] : memref<2x3x32x32xbf16, #tpu.memory_space<vmem>>, vector<1x1x32x32xbf16>
    %197 = vector.shape_cast %196 : vector<1x1x32x32xbf16> to vector<32x32xbf16>
    %cst_103 = arith.constant dense<0.000000e+00> : vector<8x32xf32>
    %198 = tpu.matmul %179, %197, %cst_103 {dimension_numbers = #tpu.dot_dimension_numbers<[1], [0], [0], [1], [0, 0, 1, 1], [], []>} : vector<8x32xbf16>, vector<32x32xbf16>, vector<8x32xf32> -> vector<8x32xf32>
    %c1_104 = arith.constant 1 : index
    %c2_105 = arith.constant 2 : index
    %c0_106 = arith.constant 0 : index
    %199 = vector.load %arg4[%c1_104, %c2_105, %c0_106] : memref<2x3x32xf32, #tpu.memory_space<vmem>>, vector<1x1x32xf32>
    %200 = vector.shape_cast %199 : vector<1x1x32xf32> to vector<32xf32>
    %201 = vector.shape_cast %200 : vector<32xf32> to vector<1x32xf32>
    %202 = vector.broadcast %201 : vector<1x32xf32> to vector<8x32xf32>
    %203 = arith.addf %198, %202 : vector<8x32xf32>
    %204 = vector.shape_cast %187 : vector<8x32xf32> to vector<1x8x4x8xf32>
    %205 = tpu.transpose %204, [0, 2, 1, 3] : vector<1x8x4x8xf32> -> vector<1x4x8x8xf32>
    %206 = vector.shape_cast %205 : vector<1x4x8x8xf32> to vector<4x8x8xf32>
    %207 = vector.shape_cast %195 : vector<8x32xf32> to vector<1x8x4x8xf32>
    %208 = tpu.transpose %207, [0, 2, 1, 3] : vector<1x8x4x8xf32> -> vector<1x4x8x8xf32>
    %209 = vector.shape_cast %208 : vector<1x4x8x8xf32> to vector<4x8x8xf32>
    %210 = vector.shape_cast %203 : vector<8x32xf32> to vector<1x8x4x8xf32>
    %211 = tpu.transpose %210, [0, 2, 1, 3] : vector<1x8x4x8xf32> -> vector<1x4x8x8xf32>
    %212 = vector.shape_cast %211 : vector<1x4x8x8xf32> to vector<4x8x8xf32>
    %213 = arith.truncf %206 : vector<4x8x8xf32> to vector<4x8x8xbf16>
    %214 = arith.truncf %209 : vector<4x8x8xf32> to vector<4x8x8xbf16>
    "tpu.trace_start"() <{level = 10 : i32, message = "bqd,bkd->bqk"}> : () -> ()
    %cst_107 = arith.constant dense<0.000000e+00> : vector<4x8x8xf32>
    %215 = tpu.matmul %213, %214, %cst_107 {dimension_numbers = #tpu.dot_dimension_numbers<[2], [2], [1], [1], [0, 0, 0, 1, 1, 1], [0], [0]>} : vector<4x8x8xbf16>, vector<4x8x8xbf16>, vector<4x8x8xf32> -> vector<4x8x8xf32>
    "tpu.trace_stop"() : () -> ()
    %216 = vector.broadcast %8 : vector<1x8x8xf32> to vector<4x8x8xf32>
    %217 = arith.addf %215, %216 : vector<4x8x8xf32>
    %cst_108 = arith.constant dense<0xFF800000> : vector<4x8xf32>
    %218 = vector.multi_reduction <maximumf>, %217, %cst_108 [2] : vector<4x8x8xf32> to vector<4x8xf32>
    %219 = vector.shape_cast %218 : vector<4x8xf32> to vector<4x8x1xf32>
    %220 = vector.broadcast %219 : vector<4x8x1xf32> to vector<4x8x8xf32>
    %221 = arith.subf %217, %220 : vector<4x8x8xf32>
    %222 = math.exp %221 : vector<4x8x8xf32>
    %cst_109 = arith.constant dense<0.000000e+00> : vector<4x8xf32>
    %223 = vector.multi_reduction <add>, %222, %cst_109 [2] : vector<4x8x8xf32> to vector<4x8xf32>
    %224 = vector.shape_cast %223 : vector<4x8xf32> to vector<4x8x1xf32>
    %225 = tpu.reciprocal %224 {approx = true} : vector<4x8x1xf32> -> vector<4x8x1xf32>
    %226 = vector.broadcast %225 : vector<4x8x1xf32> to vector<4x8x8xf32>
    %227 = arith.mulf %222, %226 : vector<4x8x8xf32>
    %228 = arith.truncf %227 : vector<4x8x8xf32> to vector<4x8x8xbf16>
    %229 = arith.truncf %212 : vector<4x8x8xf32> to vector<4x8x8xbf16>
    "tpu.trace_start"() <{level = 10 : i32, message = "bqk,bkd->bqd"}> : () -> ()
    %cst_110 = arith.constant dense<0.000000e+00> : vector<4x8x8xf32>
    %230 = tpu.matmul %228, %229, %cst_110 {dimension_numbers = #tpu.dot_dimension_numbers<[2], [1], [1], [2], [0, 0, 0, 1, 1, 2], [0], [0]>} : vector<4x8x8xbf16>, vector<4x8x8xbf16>, vector<4x8x8xf32> -> vector<4x8x8xf32>
    "tpu.trace_stop"() : () -> ()
    %231 = vector.shape_cast %230 : vector<4x8x8xf32> to vector<1x4x8x8xf32>
    %232 = tpu.transpose %231, [0, 2, 1, 3] : vector<1x4x8x8xf32> -> vector<1x8x4x8xf32>
    %233 = vector.shape_cast %232 : vector<1x8x4x8xf32> to vector<8x32xf32>
    %234 = arith.truncf %233 : vector<8x32xf32> to vector<8x32xbf16>
    %c1_111 = arith.constant 1 : index
    %c0_112 = arith.constant 0 : index
    %c0_113 = arith.constant 0 : index
    %235 = vector.load %arg5[%c1_111, %c0_112, %c0_113] : memref<2x32x32xbf16, #tpu.memory_space<vmem>>, vector<1x32x32xbf16>
    %236 = vector.shape_cast %235 : vector<1x32x32xbf16> to vector<32x32xbf16>
    %cst_114 = arith.constant dense<0.000000e+00> : vector<8x32xf32>
    %237 = tpu.matmul %234, %236, %cst_114 {dimension_numbers = #tpu.dot_dimension_numbers<[1], [0], [0], [1], [0, 0, 1, 1], [], []>} : vector<8x32xbf16>, vector<32x32xbf16>, vector<8x32xf32> -> vector<8x32xf32>
    %c1_115 = arith.constant 1 : index
    %c0_116 = arith.constant 0 : index
    %c0_117 = arith.constant 0 : index
    %238 = vector.load %arg6[%c1_115, %c0_116, %c0_117] : memref<2x2x32xf32, #tpu.memory_space<vmem>>, vector<1x1x32xf32>
    %239 = vector.shape_cast %238 : vector<1x1x32xf32> to vector<32xf32>
    %240 = vector.shape_cast %239 : vector<32xf32> to vector<1x32xf32>
    %241 = vector.broadcast %240 : vector<1x32xf32> to vector<8x32xf32>
    %242 = arith.addf %237, %241 : vector<8x32xf32>
    %243 = arith.addf %150, %242 : vector<8x32xf32>
    %c3 = arith.constant 3 : index
    %c0_118 = arith.constant 0 : index
    %c0_119 = arith.constant 0 : index
    %244 = vector.load %arg2[%c3, %c0_118, %c0_119] : memref<5x2x32xf32, #tpu.memory_space<vmem>>, vector<1x1x32xf32>
    %245 = vector.shape_cast %244 : vector<1x1x32xf32> to vector<32xf32>
    %c3_120 = arith.constant 3 : index
    %c1_121 = arith.constant 1 : index
    %c0_122 = arith.constant 0 : index
    %246 = vector.load %arg2[%c3_120, %c1_121, %c0_122] : memref<5x2x32xf32, #tpu.memory_space<vmem>>, vector<1x1x32xf32>
    %247 = vector.shape_cast %246 : vector<1x1x32xf32> to vector<32xf32>
    %cst_123 = arith.constant dense<0.000000e+00> : vector<8xf32>
    %248 = vector.multi_reduction <add>, %243, %cst_123 [1] : vector<8x32xf32> to vector<8xf32>
    %249 = vector.shape_cast %248 : vector<8xf32> to vector<8x1xf32>
    %cst_124 = arith.constant 3.200000e+01 : f32
    %250 = vector.broadcast %cst_124 : f32 to vector<8x1xf32>
    %251 = arith.divf %249, %250 : vector<8x1xf32>
    %252 = vector.broadcast %251 : vector<8x1xf32> to vector<8x32xf32>
    %253 = arith.subf %243, %252 : vector<8x32xf32>
    %254 = arith.mulf %253, %253 : vector<8x32xf32>
    %cst_125 = arith.constant dense<0.000000e+00> : vector<8xf32>
    %255 = vector.multi_reduction <add>, %254, %cst_125 [1] : vector<8x32xf32> to vector<8xf32>
    %256 = vector.shape_cast %255 : vector<8xf32> to vector<8x1xf32>
    %cst_126 = arith.constant 3.200000e+01 : f32
    %257 = vector.broadcast %cst_126 : f32 to vector<8x1xf32>
    %258 = arith.divf %256, %257 : vector<8x1xf32>
    %259 = vector.broadcast %251 : vector<8x1xf32> to vector<8x32xf32>
    %260 = arith.subf %243, %259 : vector<8x32xf32>
    %cst_127 = arith.constant 9.99999974E-6 : f32
    %261 = vector.broadcast %cst_127 : f32 to vector<8x1xf32>
    %262 = arith.addf %258, %261 : vector<8x1xf32>
    %263 = math.rsqrt %262 : vector<8x1xf32>
    %264 = vector.broadcast %263 : vector<8x1xf32> to vector<8x32xf32>
    %265 = arith.mulf %260, %264 : vector<8x32xf32>
    %266 = vector.shape_cast %245 : vector<32xf32> to vector<1x32xf32>
    %267 = vector.broadcast %266 : vector<1x32xf32> to vector<8x32xf32>
    %268 = arith.mulf %265, %267 : vector<8x32xf32>
    %269 = vector.shape_cast %247 : vector<32xf32> to vector<1x32xf32>
    %270 = vector.broadcast %269 : vector<1x32xf32> to vector<8x32xf32>
    %271 = arith.addf %268, %270 : vector<8x32xf32>
    %272 = arith.truncf %271 : vector<8x32xf32> to vector<8x32xbf16>
    %c1_128 = arith.constant 1 : index
    %c0_129 = arith.constant 0 : index
    %c0_130 = arith.constant 0 : index
    %273 = vector.load %arg7[%c1_128, %c0_129, %c0_130] : memref<2x32x128xbf16, #tpu.memory_space<vmem>>, vector<1x32x128xbf16>
    %274 = vector.shape_cast %273 : vector<1x32x128xbf16> to vector<32x128xbf16>
    %cst_131 = arith.constant dense<0.000000e+00> : vector<8x128xf32>
    %275 = tpu.matmul %272, %274, %cst_131 {dimension_numbers = #tpu.dot_dimension_numbers<[1], [0], [0], [1], [0, 0, 1, 1], [], []>} : vector<8x32xbf16>, vector<32x128xbf16>, vector<8x128xf32> -> vector<8x128xf32>
    %c1_132 = arith.constant 1 : index
    %c0_133 = arith.constant 0 : index
    %276 = vector.load %arg8[%c1_132, %c0_133] : memref<2x128xf32, #tpu.memory_space<vmem>>, vector<1x128xf32>
    %277 = vector.shape_cast %276 : vector<1x128xf32> to vector<128xf32>
    %278 = vector.shape_cast %277 : vector<128xf32> to vector<1x128xf32>
    %279 = vector.broadcast %278 : vector<1x128xf32> to vector<8x128xf32>
    %280 = arith.addf %275, %279 : vector<8x128xf32>
    %cst_134 = arith.constant 0.000000e+00 : f32
    %281 = vector.broadcast %cst_134 : f32 to vector<8x128xf32>
    %282 = arith.maximumf %280, %281 : vector<8x128xf32>
    %283 = arith.truncf %282 : vector<8x128xf32> to vector<8x128xbf16>
    %c1_135 = arith.constant 1 : index
    %c0_136 = arith.constant 0 : index
    %c0_137 = arith.constant 0 : index
    %284 = vector.load %arg9[%c1_135, %c0_136, %c0_137] : memref<2x128x32xbf16, #tpu.memory_space<vmem>>, vector<1x128x32xbf16>
    %285 = vector.shape_cast %284 : vector<1x128x32xbf16> to vector<128x32xbf16>
    %cst_138 = arith.constant dense<0.000000e+00> : vector<8x32xf32>
    %286 = tpu.matmul %283, %285, %cst_138 {dimension_numbers = #tpu.dot_dimension_numbers<[1], [0], [0], [1], [0, 0, 1, 1], [], []>} : vector<8x128xbf16>, vector<128x32xbf16>, vector<8x32xf32> -> vector<8x32xf32>
    %c1_139 = arith.constant 1 : index
    %c1_140 = arith.constant 1 : index
    %c0_141 = arith.constant 0 : index
    %287 = vector.load %arg6[%c1_139, %c1_140, %c0_141] : memref<2x2x32xf32, #tpu.memory_space<vmem>>, vector<1x1x32xf32>
    %288 = vector.shape_cast %287 : vector<1x1x32xf32> to vector<32xf32>
    %289 = vector.shape_cast %288 : vector<32xf32> to vector<1x32xf32>
    %290 = vector.broadcast %289 : vector<1x32xf32> to vector<8x32xf32>
    %291 = arith.addf %286, %290 : vector<8x32xf32>
    %292 = arith.addf %243, %291 : vector<8x32xf32>
    %c4 = arith.constant 4 : index
    %c0_142 = arith.constant 0 : index
    %c0_143 = arith.constant 0 : index
    %293 = vector.load %arg2[%c4, %c0_142, %c0_143] : memref<5x2x32xf32, #tpu.memory_space<vmem>>, vector<1x1x32xf32>
    %294 = vector.shape_cast %293 : vector<1x1x32xf32> to vector<32xf32>
    %c4_144 = arith.constant 4 : index
    %c1_145 = arith.constant 1 : index
    %c0_146 = arith.constant 0 : index
    %295 = vector.load %arg2[%c4_144, %c1_145, %c0_146] : memref<5x2x32xf32, #tpu.memory_space<vmem>>, vector<1x1x32xf32>
    %296 = vector.shape_cast %295 : vector<1x1x32xf32> to vector<32xf32>
    %cst_147 = arith.constant dense<0.000000e+00> : vector<8xf32>
    %297 = vector.multi_reduction <add>, %292, %cst_147 [1] : vector<8x32xf32> to vector<8xf32>
    %298 = vector.shape_cast %297 : vector<8xf32> to vector<8x1xf32>
    %cst_148 = arith.constant 3.200000e+01 : f32
    %299 = vector.broadcast %cst_148 : f32 to vector<8x1xf32>
    %300 = arith.divf %298, %299 : vector<8x1xf32>
    %301 = vector.broadcast %300 : vector<8x1xf32> to vector<8x32xf32>
    %302 = arith.subf %292, %301 : vector<8x32xf32>
    %303 = arith.mulf %302, %302 : vector<8x32xf32>
    %cst_149 = arith.constant dense<0.000000e+00> : vector<8xf32>
    %304 = vector.multi_reduction <add>, %303, %cst_149 [1] : vector<8x32xf32> to vector<8xf32>
    %305 = vector.shape_cast %304 : vector<8xf32> to vector<8x1xf32>
    %cst_150 = arith.constant 3.200000e+01 : f32
    %306 = vector.broadcast %cst_150 : f32 to vector<8x1xf32>
    %307 = arith.divf %305, %306 : vector<8x1xf32>
    %308 = vector.broadcast %300 : vector<8x1xf32> to vector<8x32xf32>
    %309 = arith.subf %292, %308 : vector<8x32xf32>
    %cst_151 = arith.constant 9.99999974E-6 : f32
    %310 = vector.broadcast %cst_151 : f32 to vector<8x1xf32>
    %311 = arith.addf %307, %310 : vector<8x1xf32>
    %312 = math.rsqrt %311 : vector<8x1xf32>
    %313 = vector.broadcast %312 : vector<8x1xf32> to vector<8x32xf32>
    %314 = arith.mulf %309, %313 : vector<8x32xf32>
    %315 = vector.shape_cast %294 : vector<32xf32> to vector<1x32xf32>
    %316 = vector.broadcast %315 : vector<1x32xf32> to vector<8x32xf32>
    %317 = arith.mulf %314, %316 : vector<8x32xf32>
    %318 = vector.shape_cast %296 : vector<32xf32> to vector<1x32xf32>
    %319 = vector.broadcast %318 : vector<1x32xf32> to vector<8x32xf32>
    %320 = arith.addf %317, %319 : vector<8x32xf32>
    %321 = arith.truncf %320 : vector<8x32xf32> to vector<8x32xbf16>
    %c0_152 = arith.constant 0 : index
    %c0_153 = arith.constant 0 : index
    %322 = vector.load %arg10[%c0_152, %c0_153] : memref<32x128xbf16, #tpu.memory_space<vmem>>, vector<32x128xbf16>
    %cst_154 = arith.constant dense<0.000000e+00> : vector<8x128xf32>
    %323 = tpu.matmul %321, %322, %cst_154 {dimension_numbers = #tpu.dot_dimension_numbers<[1], [0], [0], [1], [0, 0, 1, 1], [], []>} : vector<8x32xbf16>, vector<32x128xbf16>, vector<8x128xf32> -> vector<8x128xf32>
    %c0_155 = arith.constant 0 : index
    %c0_156 = arith.constant 0 : index
    %324 = vector.load %arg11[%c0_155, %c0_156] : memref<1x128xf32, #tpu.memory_space<vmem>>, vector<1x128xf32>
    %325 = vector.shape_cast %324 : vector<1x128xf32> to vector<128xf32>
    %326 = vector.shape_cast %325 : vector<128xf32> to vector<1x128xf32>
    %327 = vector.broadcast %326 : vector<1x128xf32> to vector<8x128xf32>
    %328 = arith.addf %323, %327 : vector<8x128xf32>
    %329 = vector.shape_cast %328 : vector<8x128xf32> to vector<1x8x128xf32>
    %c0_157 = arith.constant 0 : index
    %c0_158 = arith.constant 0 : index
    %c0_159 = arith.constant 0 : index
    %330 = vector.load %arg12[%c0_157, %c0_158, %c0_159] : memref<1x8x128xf32, #tpu.memory_space<vmem>>, vector<1x8x128xf32>
    tpu.vector_store %arg12[%c0_157, %c0_158, %c0_159], %329 {strides = array<i32>} : memref<1x8x128xf32, #tpu.memory_space<vmem>>, vector<1x8x128xf32>,
    return
  }
  func.func @transform_0(%arg0: i32) -> (i32, i32, i32) {
    %c0_i32 = arith.constant 0 : i32
    %c0_i32_0 = arith.constant 0 : i32
    %c0_i32_1 = arith.constant 0 : i32
    return %arg0, %c0_i32, %c0_i32_0 : i32, i32, i32
  }
  func.func @transform_1(%arg0: i32) -> (i32, i32, i32) {
    %c0_i32 = arith.constant 0 : i32
    %c0_i32_0 = arith.constant 0 : i32
    %c0_i32_1 = arith.constant 0 : i32
    %c0_i32_2 = arith.constant 0 : i32
    return %c0_i32, %c0_i32_0, %c0_i32_1 : i32, i32, i32
  }
  func.func @transform_2(%arg0: i32) -> (i32, i32, i32, i32) {
    %c0_i32 = arith.constant 0 : i32
    %c0_i32_0 = arith.constant 0 : i32
    %c0_i32_1 = arith.constant 0 : i32
    %c0_i32_2 = arith.constant 0 : i32
    %c0_i32_3 = arith.constant 0 : i32
    return %c0_i32, %c0_i32_0, %c0_i32_1, %c0_i32_2 : i32, i32, i32, i32
  }
  func.func @transform_3(%arg0: i32) -> (i32, i32, i32) {
    %c0_i32 = arith.constant 0 : i32
    %c0_i32_0 = arith.constant 0 : i32
    %c0_i32_1 = arith.constant 0 : i32
    %c0_i32_2 = arith.constant 0 : i32
    return %c0_i32, %c0_i32_0, %c0_i32_1 : i32, i32, i32
  }
  func.func @transform_4(%arg0: i32) -> (i32, i32, i32) {
    %c0_i32 = arith.constant 0 : i32
    %c0_i32_0 = arith.constant 0 : i32
    %c0_i32_1 = arith.constant 0 : i32
    %c0_i32_2 = arith.constant 0 : i32
    return %c0_i32, %c0_i32_0, %c0_i32_1 : i32, i32, i32
  }
  func.func @transform_5(%arg0: i32) -> (i32, i32, i32) {
    %c0_i32 = arith.constant 0 : i32
    %c0_i32_0 = arith.constant 0 : i32
    %c0_i32_1 = arith.constant 0 : i32
    %c0_i32_2 = arith.constant 0 : i32
    return %c0_i32, %c0_i32_0, %c0_i32_1 : i32, i32, i32
  }
  func.func @transform_6(%arg0: i32) -> (i32, i32, i32) {
    %c0_i32 = arith.constant 0 : i32
    %c0_i32_0 = arith.constant 0 : i32
    %c0_i32_1 = arith.constant 0 : i32
    %c0_i32_2 = arith.constant 0 : i32
    return %c0_i32, %c0_i32_0, %c0_i32_1 : i32, i32, i32
  }
  func.func @transform_7(%arg0: i32) -> (i32, i32) {
    %c0_i32 = arith.constant 0 : i32
    %c0_i32_0 = arith.constant 0 : i32
    %c0_i32_1 = arith.constant 0 : i32
    return %c0_i32, %c0_i32_0 : i32, i32
  }
  func.func @transform_8(%arg0: i32) -> (i32, i32, i32) {
    %c0_i32 = arith.constant 0 : i32
    %c0_i32_0 = arith.constant 0 : i32
    %c0_i32_1 = arith.constant 0 : i32
    %c0_i32_2 = arith.constant 0 : i32
    return %c0_i32, %c0_i32_0, %c0_i32_1 : i32, i32, i32
  }
  func.func @transform_9(%arg0: i32) -> (i32, i32) {
    %c0_i32 = arith.constant 0 : i32
    %c0_i32_0 = arith.constant 0 : i32
    %c0_i32_1 = arith.constant 0 : i32
    return %c0_i32, %c0_i32_0 : i32, i32
  }
  func.func @transform_10(%arg0: i32) -> (i32, i32) {
    %c0_i32 = arith.constant 0 : i32
    %c0_i32_0 = arith.constant 0 : i32
    %c0_i32_1 = arith.constant 0 : i32
    return %c0_i32, %c0_i32_0 : i32, i32
  }
  func.func @transform_11(%arg0: i32) -> (i32, i32, i32) {
    %c0_i32 = arith.constant 0 : i32
    %c0_i32_0 = arith.constant 0 : i32
    %c0_i32_1 = arith.constant 0 : i32
    return %arg0, %c0_i32, %c0_i32_0 : i32, i32, i32
  }
}

</mosaic_0001>

<bundles_post_ra>
// kernel: gpt_forward.1
= control target key start
LH: loop header
LB: loop body
LE: loop exit
PB: predicated region body
PF: predicated region fallthrough
CT: control target
= control target key end

     0   :  { %s5016_s0 = inlined_call_operand.vmem [shape: f32[2,8,32], index: 0, kind: input, shape index: {}]   ;;  %s5017_s1 = inlined_call_operand.vmem [shape: f32[5,2,32], index: 1, kind: input, shape index: {}]   ;;  %s5018_s2 = inlined_call_operand.vmem [shape: bf16[2,3,32,32], index: 2, kind: input, shape index: {}]   ;;  %s5019_s3 = inlined_call_operand.vmem [shape: f32[2,3,32], index: 3, kind: input, shape index: {}]   ;;  %s5020_s4 = inlined_call_operand.vmem [shape: bf16[2,32,32], index: 4, kind: input, shape index: {}]   ;;  %s5021_s5 = inlined_call_operand.vmem [shape: f32[2,2,32], index: 5, kind: input, shape index: {}]   ;;  %s5022_s6 = inlined_call_operand.vmem [shape: bf16[2,32,128], index: 6, kind: input, shape index: {}]   ;;  %s5023_s7 = inlined_call_operand.vmem [shape: f32[2,128], index: 7, kind: input, shape index: {}]   ;;  %s5024_s8 = inlined_call_operand.vmem [shape: bf16[2,128,32], index: 8, kind: input, shape index: {}]   ;;  %s5025_s9 = inlined_call_operand.vmem [shape: bf16[32,128], index: 9, kind: input, shape index: {}]   ;;  %s5026_s10 = inlined_call_operand.vmem [shape: f32[1,128], index: 10, kind: input, shape index: {}]   ;;  %s5027_s11 = inlined_call_operand.hbm [shape: f32[2,8,128], index: 11, kind: output, shape index: {}]  }
   0x1   :  { %5033 = sst [smem:[#allocation5_spill]] %s5016_s0 }
   0x2   :  { %16 = vsyncpa [#allocation3], 0 }
   0x3   :  { %18 = vsyncpa [#allocation3 + $0x1], 0  ;;  %s4312_s17 = smov 0   ;;  %s4314_s18 = smov 0  }
   0x4   :  { %s4316_s19 = smov 0   ;;  %s4318_s20 = smov 0  }
   0x5 LB: > { %s4333_s21 = sadd.s32 4294967295, %s4238_s20   ;;  %s3570_s22 = sadd.s32 4294967294, %s4238_s20   ;;  %s4238_s20 = sphi %s4318_s20, %s5044_s20   ;;  %s4234_s19 = sphi %s4316_s19, %s5043_s19   ;;  %s4230_s18 = sphi %s4314_s18, %s5042_s18   ;;  %s4226_s17 = sphi %s4312_s17, %s5041_s17  }
   0x6   : > { %s4337_s23 = sadd.s32 1, %s4238_s20   ;;  %s267_s24 = sadd.s32 1, %s4234_s19 }
   0x7   : > { %s264_s25 = ssub.s32 %s4238_s20, %s4337_s23  ;;  %p277_p0 = scmp.ne.s32.totalorder %s4234_s19, %s4230_s18 }
   0x8   : > { %p265_p1 = scmp.eq.s32.totalorder %s264_s25, 0  ;;  %p278_p2 = scmp.eq.s32.totalorder %s4333_s21, 1 }
   0x9   : > { %p283_p3 = scmp.ne.s32.totalorder %s4230_s18, %s4226_s17  ;;  %p284_p4 = scmp.eq.s32.totalorder %s3570_s22, 1 }
   0xa   : > { %s4348_s26 = scalar_select %p265_p1, %s4234_s19, %s267_s24  }
   0xb   : > { %p4350_p5 = por %p278_p2, %p277_p0  ;;  %p4354_p6 = por %p284_p4, %p283_p3 }
   0xc   : > { %p3573_p7 = scmp.ge.s32.totalorder %s4238_s20, 1  ;;  %p339_p8 = scmp.lt.s32.totalorder %s4238_s20, 3 }
   0xe   : > { %p340_p9 = pnand %p3573_p7, %p339_p8 }
   0xf   : > { %p378_p10 = scmp.lt.s32.totalorder (!%p340_p9), %s4333_s21, 1  ;;  %s5036_s0 = sld [smem:[#allocation5_spill]] (!%p340_p9) }
  0x10   : > { %343 = sbr.rel (%p340_p9) target bundleno = 5467 (0x155b), region = 64  ;;  %s5031_s13 = smov (!%p340_p9), 104  }
  0x11   : > { %s4244_s22 = smov (!%p340_p9), 112   ;;  %s5030_s16 = smov (!%p340_p9), 16  }
  0x12   : > { %s5029_s24 = smov (!%p340_p9), 8   ;;  %s5028_s25 = smov (!%p340_p9), 24  }
  0x13   : > { %s5037_s12 = smov (!%p340_p9), 104  }
  0x15   : > { %s379_s29 = scalar_select %p378_p10, %s4333_s21, 1  ;;  %vm392_vm0 = vcmask 261120   ;;  %v4098_v7 = vld [vmem:[%s5018_s2 + $0x8] sm:$0xff]   ;;  %v4240_v9 = vmov 0.0   ;;  %v4100_v10 = vld [vmem:[%s5018_s2] sm:$0xff]   ;;  %vm4241_vm1 = vmmov 0   ;;  %v384_v40 = vlaneseq }
  0x16   : > { %v4099_v8 = vld [vmem:[%s5018_s2 + $0x28] sm:$0xff]   ;;  %3824 = vmatprep.subr.bf16.mxu1 %v4240_v9  ;;  %3840 = vmatprep.subr.bf16.mxu0 %v4240_v9  ;;  %v4101_v11 = vld [vmem:[%s5018_s2 + $0x20] sm:$0xff]   ;;  %v4102_v21 = vld [vmem:[%s5018_s2 + $0x18] sm:$0xff]   ;;  %v4245_v43 = vmov 1983009808   ;;  %vm1052_vm3 = vcmask 64512  }
  0x17   : > { %s3575_s30 = sshll.u32 %s379_s29, 3  ;;  %3825 = vmatpush3.bf16.msra.mxu1 %v4098_v7  ;;  %3841 = vmatpush3.bf16.msra.mxu0 %v4099_v8  ;;  %v3576_v16 = vld [vmem:[%s5017_s1] ss:$0 sm:$0xff]  ;;  %v3577_v18 = vld [vmem:[%s5017_s1 + $0x1] ss:$0 sm:$0xff]  ;;  %v4103_v23 = vld [vmem:[%s5018_s2 + $0x10] sm:$0xff]   ;;  %v619_v44 = vunpack.c.l.s4 %v4245_v43 }
  0x18   : > { %s381_s14 = scalar_lea.vmem %s5036_s0, %s3575_s30  ;;  %3826 = vmatprep.subr.bf16.mxu1 %v4240_v9  ;;  %3842 = vmatprep.subr.bf16.mxu0 %v4240_v9  ;;  %v3586_v32 = vld [vmem:[%s5019_s3 + $0x1] ss:$0 sm:$0xff]  ;;  %v3578_v37 = vld [vmem:[%s5019_s3] ss:$0 sm:$0xff]  ;;  %v4430_v41 = vshrl.u32 %v384_v40, 7  ;;  %v4432_v42 = vand.u32 127, %v384_v40 }
  0x19   : > { %v4365_v0 = vld [vmem:[%s381_s14] sm:$0xff]  ;;  %3828 = vmatprep.mubr.msk.bf16.mxu1 %vm4241_vm1, %v4240_v9  ;;  %3844 = vmatprep.mubr.msk.bf16.mxu0 %vm4241_vm1, %v4240_v9  ;;  %s4243_s14 = smov 120   ;;  %v4246_v45 = vmov 1934713408   ;;  %v620_v47 = vunpack.c.0.s8 %v619_v44  ;;  %vm1292_vm4 = vcmask 1043456   ;;  %vm1623_vm5 = vcmask 130048  }
  0x1a   : > { %v393_v1 = vsel %vm392_vm0, %v4365_v0, 0.0  ;;  %vm388_vm2 = vcmp.le.s32.totalorder %v4432_v42, %v4430_v41  ;;  %v651_v46 = vunpack.c.l.s4 %v4246_v45  ;;  %vm1625_vm6 = vcmask 195584   ;;  %s3738_s29 = sshll.u32 %s4333_s21, 7  ;;  %s4251_s21 = smov [#allocation2]  }
  0x1b   : > { %394 = vadd.xlane.f32.xlu0 %v393_v1  ;;  %3827 = vmatpush3.bf16.msra.mxu1 %v4100_v10  ;;  %v4437_v51 = vsub.s32 %v620_v47, %v4430_v41 }
  0x1c   : > { %3843 = vmatpush3.bf16.msra.mxu0 %v4101_v11  ;;  %3832 = vmatprep.subr.bf16.mxu1 %v4240_v9  ;;  %v652_v50 = vunpack.c.0.s8 %v651_v46 }
  0x1d   : > { %3854 = vmatprep.subr.bf16.mxu0 %v4240_v9 }
  0x1e   : > { %v4440_v57 = vsub.s32 %v652_v50, %v4430_v41 }
  0xa4   : > { %v395_v2 = vpop.xlane.xlu0 %394 }
  0xa5   : > { %v397_v3 = vmul.f32 0.03125, %v395_v2 }
  0xa7   : > { %v398_v4 = vsub.f32 %v4365_v0, %v397_v3 }
  0xa9   : > { %v399_v5 = vmul.f32 %v398_v4, %v398_v4 }
  0xab   : > { %v400_v6 = vsel %vm392_vm0, %v399_v5, 0.0 }
  0xac   : > { %401 = vadd.xlane.f32.xlu0 %v400_v6 }
 0x135   : > { %v402_v12 = vpop.xlane.xlu0 %401 }
 0x136   : > { %v403_v13 = vmul.f32 0.03125, %v402_v12 }
 0x138   : > { %v404_v14 = vadd.f32 1e-05, %v403_v13 }
 0x13a   : > { %4136 = vrsqrt.f32 %v404_v14 }
 0x147   : > { %v4137_v15 = vpop.eup %4136 }
 0x148   : > { %v406_v17 = vmul.f32 %v4137_v15, %v398_v4 }
 0x14a   : > { %v411_v19 = vmul.f32 %v3576_v16, %v406_v17 }
 0x14c   : > { %v416_v20 = vadd.f32 %v3577_v18, %v411_v19 }
 0x14e   : > { %v417_v22 = vpack.c.bf16 %v416_v20, %v416_v20 }
 0x150   : > { %3829 = vmatmul.mubr.msk.bf16.vlgmr.msra.gmra.mxu1 %vm392_vm0, %v417_v22  ;;  %3845 = vmatmul.mubr.msk.bf16.vlgmr.msra.gmra.mxu0 %vm392_vm0, %v417_v22 }
 0x151   : > { %3833 = vmatpush3.bf16.msra.mxu1 %v4102_v21  ;;  %3836 = vmatprep.mubr.msk.bf16.mxu1 %vm4241_vm1, %v4240_v9 }
 0x152   : > { %3834 = vmatprep.subr.bf16.mxu1 %v4240_v9  ;;  %3856 = vmatprep.mubr.msk.bf16.mxu0 %vm4241_vm1, %v4240_v9 }
 0x155   : > { %3835 = vmatpush3.bf16.msra.mxu1 %v4103_v23 }
 0x156   : > { %3848 = vmatprep.subr.bf16.mxu1 %v4240_v9 }
 0x158   : > { %3837 = vmatmul.mubr.msk.bf16.vlgmr.msra.gmra.mxu1 %vm392_vm0, %v417_v22 }
 0x159   : > { %3850 = vmatprep.mubr.msk.bf16.mxu1 %vm4241_vm1, %v4240_v9 }
 0x210   : > { %v476_v24 = vpop.f32.mrf.mxu1  ;;  %v4416_v25 = vpop.f32.mrf.mxu0 }
 0x211   : > { %v477_v39 = vadd.f32 %v3578_v37, %v476_v24 }
 0x212   : > { %v3830_v26 = vpop.f32.mrf.mxu1  ;;  %v3846_v27 = vpop.f32.mrf.mxu0 }
 0x214   : > { %v479_v28 = vpop.f32.mrf.mxu1  ;;  %v603_v29 = vpop.f32.mrf.mxu0 }
 0x216   : > { %v3831_v30 = vpop.f32.mrf.mxu1  ;;  %v3847_v31 = vpop.f32.mrf.mxu0 }
 0x218   : > { %v538_v33 = vpop.f32.mrf.mxu1 }
 0x219   : > { %v539_v34 = vadd.f32 %v3586_v32, %v538_v33 }
 0x21a   : > { %v3838_v35 = vpop.f32.mrf.mxu1 }
 0x21b   : > { %759 = vrot.lane.b32.xlu0 %v539_v34, %s5031_s13  ;;  %753 = vrot.lane.b32.xlu1 %v539_v34, %s4243_s14 }
 0x21c   : > { %v541_v36 = vpop.f32.mrf.mxu1 }
 0x21e   : > { %v3839_v38 = vpop.f32.mrf.mxu1 }
 0x21f   : > { %756 = vrot.lane.b32.xlu1 %v539_v34, %s4244_s22 }
 0x223   : > { %607 = vrot.lane.b32.xlu1 %v477_v39, %s4243_s14 }
 0x227   : > { %610 = vrot.lane.b32.xlu1 %v477_v39, %s4244_s22 }
 0x22b   : > { %613 = vrot.lane.b32.xlu1 %v477_v39, %s5031_s13 }
 0x28d   : > { %v760_v48 = vpop.permute.xlu0 %759  ;;  %v754_v49 = vpop.permute.xlu1 %753 }
 0x28e   : > { %v778_v52 = vcombine.low %v754_v49, %v760_v48  ;;  %v779_v53 = vcombine.high %v754_v49, %v760_v48 }
 0x290   : > { %v786_v58 = vrot.slane %v778_v52, %v4437_v51  ;;  %v793_v59 = vrot.slane %v779_v53, %v4437_v51 }
 0x291   : > { %v757_v54 = vpop.permute.xlu1 %756 }
 0x292   : > { %v762_v55 = vcombine.low %v539_v34, %v757_v54  ;;  %v763_v56 = vcombine.high %v539_v34, %v757_v54 }
 0x294   : > { %v770_v60 = vrot.slane %v762_v55, %v4437_v51  ;;  %v777_v61 = vrot.slane %v763_v56, %v4437_v51 }
 0x295   : > { %v608_v62 = vpop.permute.xlu1 %607 }
 0x296   : > { %v794_v63 = vcombine.low %v770_v60, %v786_v58  ;;  %v795_v1 = vcombine.high %v770_v60, %v786_v58  ;;  %v810_v2 = vcombine.low %v777_v61, %v793_v59  ;;  %v811_v3 = vcombine.high %v777_v61, %v793_v59 }
 0x298   : > { %v802_v4 = vrot.slane %v794_v63, %v4440_v57  ;;  %v809_v5 = vrot.slane %v795_v1, %v4440_v57  ;;  %v818_v6 = vrot.slane %v810_v2, %v4440_v57  ;;  %v825_v7 = vrot.slane %v811_v3, %v4440_v57 }
 0x299   : > { %v611_v8 = vpop.permute.xlu1 %610 }
 0x29a   : > { %v830_v10 = vcombine.low %v802_v4, %v809_v5  ;;  %v3600_v11 = vcombine.high %v802_v4, %v809_v5  ;;  %v846_v12 = vcombine.low %v818_v6, %v825_v7  ;;  %v3601_v13 = vcombine.high %v818_v6, %v825_v7 }
 0x29b   : > { %v616_v14 = vcombine.low %v477_v39, %v611_v8  ;;  %v617_v15 = vcombine.high %v477_v39, %v611_v8 }
 0x29c   : > { %v837_v16 = vrot.slane %v830_v10, %v4437_v51  ;;  %v845_v17 = vrot.slane %v3600_v11, %v4437_v51  ;;  %v853_v18 = vrot.slane %v846_v12, %v4437_v51  ;;  %v861_v19 = vrot.slane %v3601_v13, %v4437_v51 }
 0x29d   : > { %v614_v20 = vpop.permute.xlu1 %613  ;;  %v624_v26 = vrot.slane %v616_v14, %v4437_v51  ;;  %v631_v27 = vrot.slane %v617_v15, %v4437_v51 }
 0x29e   : > { %v632_v21 = vcombine.low %v608_v62, %v614_v20  ;;  %v633_v22 = vcombine.high %v608_v62, %v614_v20  ;;  %v862_v23 = vcombine.low %v837_v16, %v845_v17  ;;  %v878_v24 = vcombine.low %v853_v18, %v861_v19 }
 0x29f   : > { %v863_v32 = vcombine.high %v837_v16, %v845_v17  ;;  %v879_v33 = vcombine.high %v853_v18, %v861_v19 }
 0x2a0   : > { %v640_v28 = vrot.slane %v632_v21, %v4437_v51  ;;  %v647_v29 = vrot.slane %v633_v22, %v4437_v51  ;;  %v870_v30 = vrot.slane %v862_v23, %v4440_v57  ;;  %v886_v31 = vrot.slane %v878_v24, %v4440_v57 }
 0x2a1   : > { %v877_v48 = vrot.slane %v863_v32, %v4440_v57  ;;  %v893_v49 = vrot.slane %v879_v33, %v4440_v57  ;;  %v4247_v22 = vmov -1e+30  }
 0x2a2   : > { %v648_v34 = vcombine.low %v624_v26, %v640_v28  ;;  %v649_v35 = vcombine.high %v624_v26, %v640_v28  ;;  %v664_v36 = vcombine.low %v631_v27, %v647_v29  ;;  %v665_v37 = vcombine.high %v631_v27, %v647_v29 }
 0x2a3   : > { %v894_v38 = vcombine.low %v870_v30, %v886_v31  ;;  %v895_v39 = vcombine.high %v870_v30, %v886_v31  ;;  %v896_v1 = vcombine.low %v877_v48, %v893_v49  ;;  %v897_v2 = vcombine.high %v877_v48, %v893_v49  ;;  %v3594_v49 = vld [vmem:[%s5019_s3 + $0x2] ss:$0 sm:$0xff] }
 0x2a4   : > { %v656_v40 = vrot.slane %v648_v34, %v4440_v57  ;;  %v663_v43 = vrot.slane %v649_v35, %v4440_v57  ;;  %v672_v44 = vrot.slane %v664_v36, %v4440_v57  ;;  %v679_v45 = vrot.slane %v665_v37, %v4440_v57 }
 0x2a5   : > { %v1048_v46 = vpack.c.bf16 %v894_v38, %v894_v38  ;;  %v1049_v47 = vpack.c.bf16 %v895_v39, %v895_v39  ;;  %v1050_v10 = vpack.c.bf16 %v896_v1, %v896_v1  ;;  %v1051_v11 = vpack.c.bf16 %v897_v2, %v897_v2 }
 0x2a6   : > { %v684_v50 = vcombine.low %v656_v40, %v663_v43  ;;  %v3598_v52 = vcombine.high %v656_v40, %v663_v43  ;;  %v700_v53 = vcombine.low %v672_v44, %v679_v45  ;;  %v3599_v54 = vcombine.high %v672_v44, %v679_v45 }
 0x2a7   : > { %v1057_v55 = vsel %vm1052_vm3, %v1048_v46, 0  ;;  %v1103_v56 = vsel %vm1052_vm3, %v1049_v47, 0  ;;  %v1149_v16 = vsel %vm1052_vm3, %v1050_v10, 0  ;;  %v1195_v17 = vsel %vm1052_vm3, %v1051_v11, 0 }
 0x2a8   : > { %v691_v58 = vrot.slane %v684_v50, %v4437_v51  ;;  %v699_v59 = vrot.slane %v3598_v52, %v4437_v51  ;;  %v707_v60 = vrot.slane %v700_v53, %v4437_v51  ;;  %v715_v61 = vrot.slane %v3599_v54, %v4437_v51  ;;  %3849 = vmatpush3.bf16.xpose.msra.mxu1 %v1057_v55 }
 0x2a9   : > { %3855 = vmatpush3.bf16.xpose.msra.mxu0 %v1103_v56  ;;  %3860 = vmatprep.subr.bf16.mxu1 %v4240_v9  ;;  %v4497_v23 = vsel %vm388_vm2, 0.0, %v4247_v22  ;;  %v601_v50 = vadd.f32 %v3594_v49, %v4416_v25 }
 0x2aa   : > { %v716_v62 = vcombine.low %v691_v58, %v699_v59  ;;  %v732_v63 = vcombine.low %v707_v60, %v715_v61  ;;  %3866 = vmatprep.subr.bf16.mxu0 %v4240_v9  ;;  %v717_v3 = vcombine.high %v691_v58, %v699_v59  ;;  %v733_v4 = vcombine.high %v707_v60, %v715_v61 }
 0x2ac   : > { %v724_v5 = vrot.slane %v716_v62, %v4440_v57  ;;  %v740_v6 = vrot.slane %v732_v63, %v4440_v57  ;;  %v731_v14 = vrot.slane %v717_v3, %v4440_v57  ;;  %v747_v15 = vrot.slane %v733_v4, %v4440_v57 }
 0x2ae   : > { %v748_v7 = vcombine.low %v724_v5, %v740_v6  ;;  %v749_v8 = vcombine.high %v724_v5, %v740_v6  ;;  %v750_v18 = vcombine.low %v731_v14, %v747_v15  ;;  %v751_v19 = vcombine.high %v731_v14, %v747_v15 }
 0x2b0   : > { %v1044_v12 = vpack.c.bf16 %v748_v7, %v748_v7  ;;  %v1045_v13 = vpack.c.bf16 %v749_v8, %v749_v8  ;;  %v1046_v20 = vpack.c.bf16 %v750_v18, %v750_v18  ;;  %v1047_v21 = vpack.c.bf16 %v751_v19, %v751_v19 }
 0x2b2   : > { %3851 = vmatmul.mubr.msk.bf16.vlgmr.msra.gmra.mxu1 %vm1052_vm3, %v1044_v12  ;;  %3857 = vmatmul.mubr.msk.bf16.vlgmr.msra.gmra.mxu0 %vm1052_vm3, %v1045_v13 }
 0x2b3   : > { %3861 = vmatpush3.bf16.xpose.msra.mxu1 %v1149_v16  ;;  %3867 = vmatpush3.bf16.xpose.msra.mxu0 %v1195_v17 }
 0x2b4   : > { %3862 = vmatprep.mubr.msk.bf16.mxu1 %vm4241_vm1, %v4240_v9  ;;  %3868 = vmatprep.mubr.msk.bf16.mxu0 %vm4241_vm1, %v4240_v9 }
 0x2b5   : > { %3872 = vmatprep.subr.bf16.mxu1 %v4240_v9  ;;  %3878 = vmatprep.subr.bf16.mxu0 %v4240_v9 }
 0x2ba   : > { %3863 = vmatmul.mubr.msk.bf16.vlgmr.msra.gmra.mxu1 %vm1052_vm3, %v1046_v20  ;;  %3869 = vmatmul.mubr.msk.bf16.vlgmr.msra.gmra.mxu0 %vm1052_vm3, %v1047_v21 }
 0x2bb   : > { %3874 = vmatprep.mubr.msk.bf16.mxu1 %vm4241_vm1, %v4240_v9  ;;  %3880 = vmatprep.mubr.msk.bf16.mxu0 %vm4241_vm1, %v4240_v9 }
 0x372   : > { %v1093_v24 = vpop.f32.mrf.mxu1  ;;  %v1139_v26 = vpop.f32.mrf.mxu0 }
 0x373   : > { %v1094_v27 = vadd.f32 %v1093_v24, %v4497_v23  ;;  %v1140_v28 = vadd.f32 %v1139_v26, %v4497_v23 }
 0x374   : > { %v3852_v29 = vpop.f32.mrf.mxu1  ;;  %v3858_v30 = vpop.f32.mrf.mxu0 }
 0x375   : > { %v1240_v31 = vsel %vm1052_vm3, %v1140_v28, -inf  ;;  %v1237_v32 = vsel %vm1052_vm3, %v1094_v27, -inf }
 0x376   : > { %1241 = vmax.xlane.f32.xlu0 %v1240_v31  ;;  %v1142_v33 = vpop.f32.mrf.mxu0  ;;  %1238 = vmax.xlane.f32.xlu1 %v1237_v32  ;;  %v1096_v34 = vpop.f32.mrf.mxu1 }
 0x378   : > { %v3853_v35 = vpop.f32.mrf.mxu1  ;;  %v3859_v41 = vpop.f32.mrf.mxu0 }
 0x37a   : > { %v1185_v42 = vpop.f32.mrf.mxu1  ;;  %v1231_v36 = vpop.f32.mrf.mxu0 }
 0x37b   : > { %v1186_v37 = vadd.f32 %v1185_v42, %v4497_v23  ;;  %v1232_v40 = vadd.f32 %v1231_v36, %v4497_v23 }
 0x37c   : > { %v3864_v38 = vpop.f32.mrf.mxu1  ;;  %v3870_v39 = vpop.f32.mrf.mxu0 }
 0x37d   : > { %v1243_v43 = vsel %vm1052_vm3, %v1186_v37, -inf  ;;  %v1246_v48 = vsel %vm1052_vm3, %v1232_v40, -inf }
 0x37e   : > { %v1234_v44 = vpop.f32.mrf.mxu0  ;;  %1244 = vmax.xlane.f32.xlu1 %v1243_v43  ;;  %v1188_v45 = vpop.f32.mrf.mxu1 }
 0x380   : > { %v3865_v46 = vpop.f32.mrf.mxu1  ;;  %v3871_v47 = vpop.f32.mrf.mxu0 }
 0x382   : > { %1247 = vmax.xlane.f32.xlu1 %v1246_v48 }
 0x393   : > { %902 = vrot.lane.b32.xlu1 %v601_v50, %s4244_s22 }
 0x3ff   : > { %v1242_v52 = vpop.xlane.xlu0 %1241  ;;  %v1239_v53 = vpop.xlane.xlu1 %1238 }
 0x400   : > { %v1250_v54 = vsub.f32 %v1140_v28, %v1242_v52  ;;  %v1249_v55 = vsub.f32 %v1094_v27, %v1239_v53 }
 0x402   : > { %v1255_v56 = vmul.f32 1.442695, %v1250_v54  ;;  %v1253_v58 = vmul.f32 1.442695, %v1249_v55 }
 0x404   : > { %4138 = vpow2.f32 %v1255_v56 }
 0x405   : > { %4140 = vpow2.f32 %v1253_v58 }
 0x407   : > { %v1245_v62 = vpop.xlane.xlu1 %1244 }
 0x408   : > { %v1251_v2 = vsub.f32 %v1186_v37, %v1245_v62 }
 0x40a   : > { %v1257_v4 = vmul.f32 1.442695, %v1251_v2 }
 0x40b   : > { %v1248_v63 = vpop.xlane.xlu1 %1247 }
 0x40c   : > { %v1252_v1 = vsub.f32 %v1232_v40, %v1248_v63 }
 0x40e   : > { %v1259_v3 = vmul.f32 1.442695, %v1252_v1 }
 0x40f   : > { %v903_v10 = vpop.permute.xlu1 %902 }
 0x410   : > { %4142 = vpow2.f32 %v1259_v3  ;;  %v908_v13 = vcombine.low %v601_v50, %v903_v10  ;;  %v909_v14 = vcombine.high %v601_v50, %v903_v10 }
 0x411   : > { %v4512_v59 = vpop.eup %4138  ;;  %4144 = vpow2.f32 %v1257_v4 }
 0x412   : > { %v4514_v60 = vpop.eup %4140  ;;  %v1264_v61 = vsel %vm1052_vm3, %v4512_v59, 0.0  ;;  %v916_v19 = vrot.slane %v908_v13, %v4437_v51  ;;  %v923_v20 = vrot.slane %v909_v14, %v4437_v51 }
 0x413   : > { %v1261_v25 = vsel %vm1052_vm3, %v4514_v60, 0.0  ;;  %1265 = vadd.xlane.f32.xlu1 %v1264_v61 }
 0x414   : > { %1262 = vadd.xlane.f32.xlu0 %v1261_v25 }
 0x41d   : > { %v4522_v5 = vpop.eup %4142 }
 0x41e   : > { %v4524_v6 = vpop.eup %4144  ;;  %v1270_v7 = vsel %vm1052_vm3, %v4522_v5, 0.0 }
 0x41f   : > { %v1267_v8 = vsel %vm1052_vm3, %v4524_v6, 0.0 }
 0x424   : > { %905 = vrot.lane.b32.xlu1 %v601_v50, %s5031_s13  ;;  %s5038_s13 = smov 16  }
 0x42a   : > { %899 = vrot.lane.b32.xlu0 %v601_v50, %s4243_s14 }
 0x448   : > { %1271 = vadd.xlane.f32.xlu1 %v1270_v7 }
 0x449   : > { %1268 = vadd.xlane.f32.xlu0 %v1267_v8 }
 0x49c   : > { %v1266_v11 = vpop.xlane.xlu1 %1265 }
 0x49d   : > { %v1263_v12 = vpop.xlane.xlu0 %1262  ;;  %4146 = vrcp.f32 %v1266_v11 }
 0x49e   : > { %4148 = vrcp.f32 %v1263_v12 }
 0x4a0   : > { %v906_v15 = vpop.permute.xlu1 %905 }
 0x4a1   : > { %v900_v16 = vpop.permute.xlu0 %899 }
 0x4a2   : > { %v924_v17 = vcombine.low %v900_v16, %v906_v15  ;;  %v925_v18 = vcombine.high %v900_v16, %v906_v15 }
 0x4a4   : > { %v932_v21 = vrot.slane %v924_v17, %v4437_v51  ;;  %v939_v22 = vrot.slane %v925_v18, %v4437_v51 }
 0x4a6   : > { %v940_v24 = vcombine.low %v916_v19, %v932_v21  ;;  %v941_v26 = vcombine.high %v916_v19, %v932_v21  ;;  %v956_v27 = vcombine.low %v923_v20, %v939_v22  ;;  %v957_v28 = vcombine.high %v923_v20, %v939_v22 }
 0x4a8   : > { %v948_v29 = vrot.slane %v940_v24, %v4440_v57  ;;  %v955_v30 = vrot.slane %v941_v26, %v4440_v57  ;;  %v964_v31 = vrot.slane %v956_v27, %v4440_v57  ;;  %v971_v32 = vrot.slane %v957_v28, %v4440_v57 }
 0x4aa   : > { %v976_v33 = vcombine.low %v948_v29, %v955_v30  ;;  %v3602_v34 = vcombine.high %v948_v29, %v955_v30  ;;  %v992_v35 = vcombine.low %v964_v31, %v971_v32  ;;  %v3603_v41 = vcombine.high %v964_v31, %v971_v32  ;;  %v4147_v45 = vpop.eup %4146 }
 0x4ab   : > { %v4149_v50 = vpop.eup %4148  ;;  %v1278_v25 = vmul.f32 %v4147_v45, %v4512_v59 }
 0x4ac   : > { %v983_v42 = vrot.slane %v976_v33, %v4437_v51  ;;  %v991_v36 = vrot.slane %v3602_v34, %v4437_v51  ;;  %v999_v37 = vrot.slane %v992_v35, %v4437_v51  ;;  %v1007_v38 = vrot.slane %v3603_v41, %v4437_v51 }
 0x4ad   : > { %v1277_v61 = vmul.f32 %v4149_v50, %v4514_v60  ;;  %v1282_v4 = vpack.c.bf16 %v1278_v25, %v1278_v25 }
 0x4ae   : > { %v1008_v39 = vcombine.low %v983_v42, %v991_v36  ;;  %v1024_v40 = vcombine.low %v999_v37, %v1007_v38  ;;  %v1009_v43 = vcombine.high %v983_v42, %v991_v36  ;;  %v1025_v44 = vcombine.high %v999_v37, %v1007_v38 }
 0x4af   : > { %v1281_v3 = vpack.c.bf16 %v1277_v61, %v1277_v61 }
 0x4b0   : > { %v1016_v46 = vrot.slane %v1008_v39, %v4440_v57  ;;  %v1032_v47 = vrot.slane %v1024_v40, %v4440_v57  ;;  %v1023_v48 = vrot.slane %v1009_v43, %v4440_v57  ;;  %v1039_v49 = vrot.slane %v1025_v44, %v4440_v57  ;;  %v4104_v43 = vld [vmem:[%s5020_s4 + $0x8] sm:$0xff]  }
 0x4b2   : > { %v1040_v52 = vcombine.low %v1016_v46, %v1032_v47  ;;  %v1041_v53 = vcombine.high %v1016_v46, %v1032_v47  ;;  %v1042_v54 = vcombine.low %v1023_v48, %v1039_v49  ;;  %v1043_v55 = vcombine.high %v1023_v48, %v1039_v49 }
 0x4b4   : > { %v1285_v56 = vpack.c.bf16 %v1040_v52, %v1040_v52  ;;  %v1286_v58 = vpack.c.bf16 %v1041_v53, %v1041_v53  ;;  %v1287_v1 = vpack.c.bf16 %v1042_v54, %v1042_v54  ;;  %v1288_v2 = vpack.c.bf16 %v1043_v55, %v1043_v55  ;;  %v4105_v54 = vld [vmem:[%s5020_s4] sm:$0xff]  }
 0x4b6   : > { %v1294_v62 = vsel %vm1292_vm4, %v1285_v56, 0  ;;  %v1340_v63 = vsel %vm1292_vm4, %v1286_v58, 0  ;;  %v1386_v59 = vsel %vm1292_vm4, %v1287_v1, 0  ;;  %v1432_v60 = vsel %vm1292_vm4, %v1288_v2, 0 }
 0x4b7   : > { %3873 = vmatpush3.bf16.msra.mxu1 %v1294_v62  ;;  %3879 = vmatpush3.bf16.msra.mxu0 %v1340_v63 }
 0x4b8   : > { %3884 = vmatprep.subr.bf16.mxu1 %v4240_v9  ;;  %3890 = vmatprep.subr.bf16.mxu0 %v4240_v9 }
 0x4ba   : > { %3875 = vmatmul.mubr.msk.bf16.vlgmr.msra.gmra.mxu1 %vm1052_vm3, %v1281_v3  ;;  %3881 = vmatmul.mubr.msk.bf16.vlgmr.msra.gmra.mxu0 %vm1052_vm3, %v1282_v4 }
 0x4bb   : > { %3885 = vmatpush3.bf16.msra.mxu1 %v1386_v59  ;;  %3891 = vmatpush3.bf16.msra.mxu0 %v1432_v60 }
 0x4bc   : > { %3886 = vmatprep.mubr.msk.bf16.mxu1 %vm4241_vm1, %v4240_v9  ;;  %3892 = vmatprep.mubr.msk.bf16.mxu0 %vm4241_vm1, %v4240_v9 }
 0x4bd   : > { %3896 = vmatprep.subr.bf16.mxu1 %v4240_v9  ;;  %3904 = vmatprep.subr.bf16.mxu0 %v4240_v9 }
 0x4d1   : > { %v1272_v7 = vpop.xlane.xlu1 %1271 }
 0x4d2   : > { %v1269_v8 = vpop.xlane.xlu0 %1268  ;;  %4150 = vrcp.f32 %v1272_v7 }
 0x4d3   : > { %4152 = vrcp.f32 %v1269_v8 }
 0x4df   : > { %v4151_v10 = vpop.eup %4150 }
 0x4e0   : > { %v4153_v11 = vpop.eup %4152  ;;  %v1280_v12 = vmul.f32 %v4151_v10, %v4522_v5 }
 0x4e1   : > { %v1279_v13 = vmul.f32 %v4153_v11, %v4524_v6 }
 0x4e2   : > { %v1284_v14 = vpack.c.bf16 %v1280_v12, %v1280_v12 }
 0x4e3   : > { %v1283_v15 = vpack.c.bf16 %v1279_v13, %v1279_v13 }
 0x4e4   : > { %3893 = vmatmul.mubr.msk.bf16.vlgmr.msra.gmra.mxu0 %vm1052_vm3, %v1284_v14 }
 0x4e5   : > { %3887 = vmatmul.mubr.msk.bf16.vlgmr.msra.gmra.mxu1 %vm1052_vm3, %v1283_v15  ;;  %3908 = vmatprep.mubr.msk.bf16.mxu0 %vm4241_vm1, %v4240_v9 }
 0x4e6   : > { %3900 = vmatprep.mubr.msk.bf16.mxu1 %vm4241_vm1, %v4240_v9  ;;  %3897 = vmatpush3.bf16.msra.mxu1 %v4104_v43 }
 0x4e7   : > { %3898 = vmatprep.subr.bf16.mxu1 %v4240_v9 }
 0x4ea   : > { %3899 = vmatpush3.bf16.msra.mxu1 %v4105_v54 }
 0x4eb   : > { %3912 = vmatprep.subr.bf16.mxu1 %v4240_v9 }
 0x57a   : > { %v1330_v16 = vpop.f32.mrf.mxu1  ;;  %v1376_v17 = vpop.f32.mrf.mxu0 }
 0x57c   : > { %v3876_v18 = vpop.f32.mrf.mxu1  ;;  %v3882_v19 = vpop.f32.mrf.mxu0 }
 0x57d   : > { %v3614_v18 = vld [vmem:[%s5021_s5] ss:$0 sm:$0xff] }
 0x57e   : > { %v1333_v20 = vpop.f32.mrf.mxu1  ;;  %v1379_v5 = vpop.f32.mrf.mxu0 }
 0x580   : > { %v3877_v21 = vpop.f32.mrf.mxu1  ;;  %v3883_v6 = vpop.f32.mrf.mxu0 }
 0x5a4   : > { %v1468_v22 = vpop.f32.mrf.mxu0 }
 0x5a5   : > { %v1422_v24 = vpop.f32.mrf.mxu1  ;;  %v1490_v26 = vcombine.low %v1376_v17, %v1468_v22  ;;  %v1491_v27 = vcombine.high %v1376_v17, %v1468_v22 }
 0x5a6   : > { %v1474_v28 = vcombine.low %v1330_v16, %v1422_v24  ;;  %v1475_v29 = vcombine.high %v1330_v16, %v1422_v24  ;;  %v3894_v30 = vpop.f32.mrf.mxu0 }
 0x5a7   : > { %v1498_v31 = vrot.slane %v1490_v26, %v4437_v51  ;;  %v1505_v32 = vrot.slane %v1491_v27, %v4437_v51  ;;  %v3888_v33 = vpop.f32.mrf.mxu1 }
 0x5a8   : > { %v1482_v34 = vrot.slane %v1474_v28, %v4437_v51  ;;  %v1489_v35 = vrot.slane %v1475_v29, %v4437_v51  ;;  %v1471_v41 = vpop.f32.mrf.mxu0  ;;  %v4109_v33 = vld [vmem:[%s5024_s8 + $0x30] sm:$0xff]  }
 0x5a9   : > { %v1425_v42 = vpop.f32.mrf.mxu1  ;;  %v4112_v41 = vld [vmem:[%s5024_s8 + $0x18] sm:$0xff]  }
 0x5aa   : > { %v1506_v36 = vcombine.low %v1482_v34, %v1498_v31  ;;  %v1507_v37 = vcombine.high %v1482_v34, %v1498_v31  ;;  %v1522_v38 = vcombine.low %v1489_v35, %v1505_v32  ;;  %v1523_v39 = vcombine.high %v1489_v35, %v1505_v32  ;;  %v3895_v40 = vpop.f32.mrf.mxu0  ;;  %v4106_v31 = vld [vmem:[%s5022_s6 + $0x8] sm:$0xff]   ;;  %v4108_v32 = vld [vmem:[%s5024_s8 + $0x38] sm:$0xff]   ;;  %v4111_v35 = vld [vmem:[%s5024_s8 + $0x20] sm:$0xff]  }
 0x5ab   : > { %v3889_v44 = vpop.f32.mrf.mxu1  ;;  %3905 = vmatpush3.bf16.msra.mxu0 %v4106_v31  ;;  %v4110_v34 = vld [vmem:[%s5024_s8 + $0x28] sm:$0xff]   ;;  %v4113_v42 = vld [vmem:[%s5024_s8 + $0x10] sm:$0xff]   ;;  %v3620_v40 = vld [vmem:[%s5017_s1 + $0x2] ss:$0 sm:$0xff] }
 0x5ac   : > { %v1514_v45 = vrot.slane %v1506_v36, %v4440_v57  ;;  %v1521_v46 = vrot.slane %v1507_v37, %v4440_v57  ;;  %v1530_v47 = vrot.slane %v1522_v38, %v4440_v57  ;;  %v1537_v48 = vrot.slane %v1523_v39, %v4440_v57  ;;  %3906 = vmatprep.subr.bf16.mxu0 %v4240_v9  ;;  %v3621_v44 = vld [vmem:[%s5017_s1 + $0x3] ss:$0 sm:$0xff] }
 0x5ae   : > { %v1542_v49 = vcombine.low %v1514_v45, %v1521_v46  ;;  %v3612_v50 = vcombine.high %v1514_v45, %v1521_v46  ;;  %v1558_v52 = vcombine.low %v1530_v47, %v1537_v48  ;;  %v3613_v53 = vcombine.high %v1530_v47, %v1537_v48  ;;  %v4114_v48 = vld [vmem:[%s5024_s8 + $0x8] sm:$0xff]  }
 0x5b0   : > { %v1549_v55 = vrot.slane %v1542_v49, %v4437_v51  ;;  %v1557_v56 = vrot.slane %v3612_v50, %v4437_v51  ;;  %v1565_v58 = vrot.slane %v1558_v52, %v4437_v51  ;;  %v1573_v61 = vrot.slane %v3613_v53, %v4437_v51  ;;  %v4115_v49 = vld [vmem:[%s5024_s8] sm:$0xff]  }
 0x5b1   : > { %v3622_v50 = vld [vmem:[%s5023_s7] ss:$0 sm:$0xff] }
 0x5b2   : > { %v1575_v25 = vcombine.high %v1549_v55, %v1557_v56  ;;  %v1591_v62 = vcombine.high %v1565_v58, %v1573_v61  ;;  %v1574_v63 = vcombine.low %v1549_v55, %v1557_v56  ;;  %v1590_v1 = vcombine.low %v1565_v58, %v1573_v61 }
 0x5b4   : > { %v1589_v2 = vrot.slane %v1575_v25, %v4440_v57  ;;  %v1605_v3 = vrot.slane %v1591_v62, %v4440_v57  ;;  %v1582_v4 = vrot.slane %v1574_v63, %v4440_v57  ;;  %v1598_v59 = vrot.slane %v1590_v1, %v4440_v57  ;;  %v3626_v25 = vld [vmem:[%s5021_s5 + $0x1] ss:$0 sm:$0xff] }
 0x5b6   : > { %v1608_v60 = vcombine.low %v1589_v2, %v1605_v3  ;;  %v1607_v7 = vcombine.high %v1582_v4, %v1598_v59  ;;  %v1606_v8 = vcombine.low %v1582_v4, %v1598_v59  ;;  %v1609_v10 = vcombine.high %v1589_v2, %v1605_v3 }
 0x5b8   : > { %1615 = vrot.lane.b32.xlu1 %v1608_v60, %s5030_s16  ;;  %1611 = vrot.lane.b32.xlu0 %v1607_v7, %s5029_s24  ;;  %s5039_s16 = smov 8  }
 0x5bc   : > { %1619 = vrot.lane.b32.xlu0 %v1609_v10, %s5028_s25  ;;  %s5040_s25 = smov 24  }
 0x62a   : > { %v1612_v11 = vpop.permute.xlu0 %1611  ;;  %v1616_v12 = vpop.permute.xlu1 %1615 }
 0x62b   : > { %v1622_v13 = vsel %vm1052_vm3, %v1606_v8, %v1612_v11 }
 0x62c   : > { %v1624_v15 = vsel %vm1623_vm5, %v1622_v13, %v1616_v12  ;;  %v4116_v12 = vld [vmem:[%s5018_s2 + $0x38] sm:$0xff]   ;;  %v4117_v13 = vld [vmem:[%s5018_s2 + $0x30] sm:$0xff]  }
 0x62e   : > { %v1620_v14 = vpop.permute.xlu0 %1619 }
 0x62f   : > { %v1626_v16 = vsel %vm1625_vm6, %v1624_v15, %v1620_v14 }
 0x630   : > { %v1627_v17 = vpack.c.bf16 %v1626_v16, %v1626_v16 }
 0x632   : > { %3901 = vmatmul.mubr.msk.bf16.vlgmr.msra.gmra.mxu1 %vm392_vm0, %v1627_v17 }
 0x633   : > { %3928 = vmatprep.mubr.msk.bf16.mxu1 %vm4241_vm1, %v4240_v9  ;;  %3913 = vmatpush3.bf16.msra.mxu1 %v4108_v32 }
 0x634   : > { %3914 = vmatprep.subr.bf16.mxu1 %v4240_v9 }
 0x637   : > { %3915 = vmatpush3.bf16.msra.mxu1 %v4109_v33 }
 0x638   : > { %3916 = vmatprep.subr.bf16.mxu1 %v4240_v9 }
 0x63b   : > { %3917 = vmatpush3.bf16.msra.mxu1 %v4110_v34  ;;  %v3644_v34 = vld [vmem:[%s5019_s3 + $0x4] ss:$0 sm:$0xff] }
 0x63c   : > { %3918 = vmatprep.subr.bf16.mxu1 %v4240_v9 }
 0x63f   : > { %3919 = vmatpush3.bf16.msra.mxu1 %v4111_v35 }
 0x640   : > { %3920 = vmatprep.subr.bf16.mxu1 %v4240_v9 }
 0x643   : > { %3921 = vmatpush3.bf16.msra.mxu1 %v4112_v41 }
 0x644   : > { %3922 = vmatprep.subr.bf16.mxu1 %v4240_v9 }
 0x647   : > { %3923 = vmatpush3.bf16.msra.mxu1 %v4113_v42 }
 0x648   : > { %3924 = vmatprep.subr.bf16.mxu1 %v4240_v9 }
 0x64b   : > { %3925 = vmatpush3.bf16.msra.mxu1 %v4114_v48 }
 0x64c   : > { %3926 = vmatprep.subr.bf16.mxu1 %v4240_v9 }
 0x64f   : > { %3927 = vmatpush3.bf16.msra.mxu1 %v4115_v49 }
 0x650   : > { %3962 = vmatprep.subr.bf16.mxu1 %v4240_v9 }
 0x6f2   : > { %v1686_v19 = vpop.f32.mrf.mxu1 }
 0x6f3   : > { %v1687_v20 = vadd.f32 %v3614_v18, %v1686_v19  ;;  %v3637_v18 = vld [vmem:[%s5017_s1 + $0x4] ss:$0 sm:$0xff] }
 0x6f4   : > { %v3902_v5 = vpop.f32.mrf.mxu1 }
 0x6f5   : > { %v4607_v21 = vadd.f32 %v1687_v20, %v4365_v0  ;;  %v4107_v0 = vld [vmem:[%s5022_s6] sm:$0xff]  }
 0x6f6   : > { %v1689_v6 = vpop.f32.mrf.mxu1  ;;  %3907 = vmatpush3.bf16.msra.mxu0 %v4107_v0  ;;  %v3638_v20 = vld [vmem:[%s5017_s1 + $0x5] ss:$0 sm:$0xff] }
 0x6f7   : > { %v1696_v22 = vsel %vm392_vm0, %v4607_v21, 0.0  ;;  %3932 = vmatprep.subr.bf16.mxu0 %v4240_v9  ;;  %v4118_v6 = vld [vmem:[%s5018_s2 + $0x48] sm:$0xff]   ;;  %v3653_v0 = vld [vmem:[%s5019_s3 + $0x5] ss:$0 sm:$0xff] }
 0x6f8   : > { %1697 = vadd.xlane.f32.xlu1 %v1696_v22  ;;  %v3903_v24 = vpop.f32.mrf.mxu1 }
 0x6f9   : > { %v4119_v24 = vld [vmem:[%s5018_s2 + $0x40] sm:$0xff]  }
 0x781   : > { %v1698_v26 = vpop.xlane.xlu1 %1697 }
 0x782   : > { %v1699_v27 = vmul.f32 0.03125, %v1698_v26  ;;  %v4120_v26 = vld [vmem:[%s5018_s2 + $0x58] sm:$0xff]  }
 0x784   : > { %v1700_v28 = vsub.f32 %v4607_v21, %v1699_v27  ;;  %v4121_v27 = vld [vmem:[%s5018_s2 + $0x50] sm:$0xff]  }
 0x786   : > { %v1701_v29 = vmul.f32 %v1700_v28, %v1700_v28 }
 0x788   : > { %v1702_v30 = vsel %vm392_vm0, %v1701_v29, 0.0 }
 0x789   : > { %1703 = vadd.xlane.f32.xlu0 %v1702_v30 }
 0x812   : > { %v1704_v36 = vpop.xlane.xlu0 %1703 }
 0x813   : > { %v1705_v37 = vmul.f32 0.03125, %v1704_v36 }
 0x815   : > { %v1706_v38 = vadd.f32 1e-05, %v1705_v37 }
 0x817   : > { %4154 = vrsqrt.f32 %v1706_v38 }
 0x824   : > { %v4155_v39 = vpop.eup %4154 }
 0x825   : > { %v1708_v43 = vmul.f32 %v4155_v39, %v1700_v28 }
 0x827   : > { %v1713_v45 = vmul.f32 %v3620_v40, %v1708_v43 }
 0x829   : > { %v1718_v46 = vadd.f32 %v3621_v44, %v1713_v45 }
 0x82b   : > { %v1719_v47 = vpack.c.bf16 %v1718_v46, %v1718_v46 }
 0x82d   : > { %3909 = vmatmul.mubr.msk.bf16.vlgmr.msra.gmra.mxu0 %vm392_vm0, %v1719_v47 }
 0x82e   : > { %3936 = vmatprep.mubr.msk.bf16.mxu0 %vm4241_vm1, %v4240_v9  ;;  %3933 = vmatpush3.bf16.msra.mxu0 %v4116_v12 }
 0x82f   : > { %3934 = vmatprep.subr.bf16.mxu0 %v4240_v9 }
 0x832   : > { %3935 = vmatpush3.bf16.msra.mxu0 %v4117_v13 }
 0x833   : > { %3940 = vmatprep.subr.bf16.mxu0 %v4240_v9 }
 0x8ed   : > { %v1778_v52 = vpop.f32.mrf.mxu0 }
 0x8ee   : > { %v1779_v53 = vadd.f32 %v3622_v50, %v1778_v52 }
 0x8ef   : > { %v3910_v54 = vpop.f32.mrf.mxu0 }
 0x8f0   : > { %v1784_v55 = vmax.f32 %v1779_v53, 0.0 }
 0x8f1   : > { %v1781_v56 = vpop.f32.mrf.mxu0 }
 0x8f2   : > { %v1785_v58 = vpack.c.bf16 %v1784_v55, %v1784_v55 }
 0x8f3   : > { %v3911_v61 = vpop.f32.mrf.mxu0 }
 0x8f4   : > { %3929 = vmatmul.mubr.bf16.vlgmr.msra.gmra.mxu1 %v1785_v58 }
 0x8f5   : > { %3964 = vmatprep.mubr.msk.bf16.mxu1 %vm4241_vm1, %v4240_v9 }
 0x9b4   : > { %v1889_v62 = vpop.f32.mrf.mxu1 }
 0x9b5   : > { %v1890_v63 = vadd.f32 %v3626_v25, %v1889_v62 }
 0x9b6   : > { %v3930_v1 = vpop.f32.mrf.mxu1 }
 0x9b7   : > { %v4671_v2 = vadd.f32 %v1890_v63, %v4607_v21 }
 0x9b8   : > { %v1892_v3 = vpop.f32.mrf.mxu1 }
 0x9b9   : > { %v1899_v4 = vsel %vm392_vm0, %v4671_v2, 0.0 }
 0x9ba   : > { %1900 = vadd.xlane.f32.xlu0 %v1899_v4  ;;  %v3931_v59 = vpop.f32.mrf.mxu1 }
 0xa43   : > { %v1901_v60 = vpop.xlane.xlu0 %1900 }
 0xa44   : > { %v1902_v7 = vmul.f32 0.03125, %v1901_v60 }
 0xa46   : > { %v1903_v8 = vsub.f32 %v4671_v2, %v1902_v7 }
 0xa48   : > { %v1904_v10 = vmul.f32 %v1903_v8, %v1903_v8 }
 0xa4a   : > { %v1905_v11 = vsel %vm392_vm0, %v1904_v10, 0.0 }
 0xa4b   : > { %1906 = vadd.xlane.f32.xlu1 %v1905_v11 }
 0xad4   : > { %v1907_v14 = vpop.xlane.xlu1 %1906 }
 0xad5   : > { %v1908_v15 = vmul.f32 0.03125, %v1907_v14 }
 0xad7   : > { %v1909_v16 = vadd.f32 1e-05, %v1908_v15 }
 0xad9   : > { %4156 = vrsqrt.f32 %v1909_v16 }
 0xae6   : > { %v4157_v17 = vpop.eup %4156 }
 0xae7   : > { %v1911_v19 = vmul.f32 %v4157_v17, %v1903_v8 }
 0xae9   : > { %v1916_v5 = vmul.f32 %v3637_v18, %v1911_v19 }
 0xaeb   : > { %v1921_v21 = vadd.f32 %v3638_v20, %v1916_v5 }
 0xaed   : > { %v1922_v22 = vpack.c.bf16 %v1921_v21, %v1921_v21 }
 0xaef   : > { %3937 = vmatmul.mubr.msk.bf16.vlgmr.msra.gmra.mxu0 %vm392_vm0, %v1922_v22 }
 0xaf0   : > { %3941 = vmatpush3.bf16.msra.mxu0 %v4118_v6  ;;  %3944 = vmatprep.mubr.msk.bf16.mxu0 %vm4241_vm1, %v4240_v9 }
 0xaf1   : > { %3942 = vmatprep.subr.bf16.mxu0 %v4240_v9 }
 0xaf4   : > { %3943 = vmatpush3.bf16.msra.mxu0 %v4119_v24 }
 0xaf5   : > { %3948 = vmatprep.subr.bf16.mxu0 %v4240_v9 }
 0xaf7   : > { %3945 = vmatmul.mubr.msk.bf16.vlgmr.msra.gmra.mxu0 %vm392_vm0, %v1922_v22 }
 0xaf8   : > { %3949 = vmatpush3.bf16.msra.mxu0 %v4120_v26  ;;  %3952 = vmatprep.mubr.msk.bf16.mxu0 %vm4241_vm1, %v4240_v9 }
 0xaf9   : > { %3950 = vmatprep.subr.bf16.mxu0 %v4240_v9 }
 0xafc   : > { %3951 = vmatpush3.bf16.msra.mxu0 %v4121_v27 }
 0xafd   : > { %3956 = vmatprep.subr.bf16.mxu0 %v4240_v9 }
 0xaff   : > { %3953 = vmatmul.mubr.msk.bf16.vlgmr.msra.gmra.mxu0 %vm392_vm0, %v1922_v22 }
 0xb00   : > { %3958 = vmatprep.mubr.msk.bf16.mxu0 %vm4241_vm1, %v4240_v9 }
 0xbaf   : > { %v1983_v28 = vpop.f32.mrf.mxu0 }
 0xbb0   : > { %v1984_v42 = vadd.f32 %v3644_v34, %v1983_v28 }
 0xbb1   : > { %v3938_v29 = vpop.f32.mrf.mxu0 }
 0xbb3   : > { %v1986_v30 = vpop.f32.mrf.mxu0 }
 0xbb5   : > { %v3939_v31 = vpop.f32.mrf.mxu0 }
 0xbb7   : > { %v2045_v32 = vpop.f32.mrf.mxu0 }
 0xbb8   : > { %v2046_v33 = vadd.f32 %v3653_v0, %v2045_v32 }
 0xbb9   : > { %v3946_v35 = vpop.f32.mrf.mxu0 }
 0xbba   : > { %2263 = vrot.lane.b32.xlu1 %v2046_v33, %s4244_s22  ;;  %2260 = vrot.lane.b32.xlu0 %v2046_v33, %s4243_s14 }
 0xbbb   : > { %v2048_v41 = vpop.f32.mrf.mxu0 }
 0xbbd   : > { %v3947_v36 = vpop.f32.mrf.mxu0 }
 0xbbe   : > { %2266 = vrot.lane.b32.xlu1 %v2046_v33, %s5037_s12  ;;  %2114 = vrot.lane.b32.xlu0 %v1984_v42, %s4243_s14 }
 0xbbf   : > { %v4726_v37 = vpop.f32.mrf.mxu0 }
 0xbc1   : > { %v3954_v38 = vpop.f32.mrf.mxu0 }
 0xbc2   : > { %2117 = vrot.lane.b32.xlu1 %v1984_v42, %s4244_s22  ;;  %2120 = vrot.lane.b32.xlu0 %v1984_v42, %s5037_s12 }
 0xbc3   : > { %v2110_v39 = vpop.f32.mrf.mxu0 }
 0xbc5   : > { %v3955_v40 = vpop.f32.mrf.mxu0 }
 0xc2c   : > { %v2264_v43 = vpop.permute.xlu1 %2263  ;;  %v2261_v44 = vpop.permute.xlu0 %2260 }
 0xc2d   : > { %v2269_v45 = vcombine.low %v2046_v33, %v2264_v43  ;;  %v2270_v46 = vcombine.high %v2046_v33, %v2264_v43 }
 0xc2f   : > { %v2277_v52 = vrot.slane %v2269_v45, %v4437_v51  ;;  %v2284_v53 = vrot.slane %v2270_v46, %v4437_v51 }
 0xc30   : > { %v2267_v47 = vpop.permute.xlu1 %2266  ;;  %v2115_v48 = vpop.permute.xlu0 %2114 }
 0xc31   : > { %v2285_v49 = vcombine.low %v2261_v44, %v2267_v47  ;;  %v2286_v50 = vcombine.high %v2261_v44, %v2267_v47 }
 0xc33   : > { %v2293_v54 = vrot.slane %v2285_v49, %v4437_v51  ;;  %v2300_v55 = vrot.slane %v2286_v50, %v4437_v51 }
 0xc34   : > { %v2118_v56 = vpop.permute.xlu1 %2117  ;;  %v2121_v58 = vpop.permute.xlu0 %2120 }
 0xc35   : > { %v2301_v61 = vcombine.low %v2277_v52, %v2293_v54  ;;  %v2302_v25 = vcombine.high %v2277_v52, %v2293_v54  ;;  %v2317_v62 = vcombine.low %v2284_v53, %v2300_v55  ;;  %v2318_v63 = vcombine.high %v2284_v53, %v2300_v55 }
 0xc36   : > { %v2123_v1 = vcombine.low %v1984_v42, %v2118_v56  ;;  %v2124_v3 = vcombine.high %v1984_v42, %v2118_v56  ;;  %v2139_v4 = vcombine.low %v2115_v48, %v2121_v58  ;;  %v2140_v59 = vcombine.high %v2115_v48, %v2121_v58 }
 0xc37   : > { %v2309_v60 = vrot.slane %v2301_v61, %v4440_v57  ;;  %v2316_v7 = vrot.slane %v2302_v25, %v4440_v57  ;;  %v2325_v8 = vrot.slane %v2317_v62, %v4440_v57  ;;  %v2332_v10 = vrot.slane %v2318_v63, %v4440_v57 }
 0xc38   : > { %v2131_v11 = vrot.slane %v2123_v1, %v4437_v51  ;;  %v2138_v12 = vrot.slane %v2124_v3, %v4437_v51  ;;  %v2147_v13 = vrot.slane %v2139_v4, %v4437_v51  ;;  %v2154_v14 = vrot.slane %v2140_v59, %v4437_v51 }
 0xc39   : > { %v2337_v15 = vcombine.low %v2309_v60, %v2316_v7  ;;  %v3668_v16 = vcombine.high %v2309_v60, %v2316_v7  ;;  %v2353_v17 = vcombine.low %v2325_v8, %v2332_v10  ;;  %v3669_v18 = vcombine.high %v2325_v8, %v2332_v10 }
 0xc3a   : > { %v2155_v19 = vcombine.low %v2131_v11, %v2147_v13  ;;  %v2156_v20 = vcombine.high %v2131_v11, %v2147_v13  ;;  %v2171_v5 = vcombine.low %v2138_v12, %v2154_v14  ;;  %v2172_v21 = vcombine.high %v2138_v12, %v2154_v14 }
 0xc3b   : > { %v2344_v6 = vrot.slane %v2337_v15, %v4437_v51  ;;  %v2352_v22 = vrot.slane %v3668_v16, %v4437_v51  ;;  %v2360_v24 = vrot.slane %v2353_v17, %v4437_v51  ;;  %v2368_v26 = vrot.slane %v3669_v18, %v4437_v51 }
 0xc3c   : > { %v2163_v27 = vrot.slane %v2155_v19, %v4440_v57  ;;  %v2170_v28 = vrot.slane %v2156_v20, %v4440_v57  ;;  %v2179_v29 = vrot.slane %v2171_v5, %v4440_v57  ;;  %v2186_v30 = vrot.slane %v2172_v21, %v4440_v57 }
 0xc3d   : > { %v2369_v31 = vcombine.low %v2344_v6, %v2352_v22  ;;  %v2385_v0 = vcombine.low %v2360_v24, %v2368_v26  ;;  %v2370_v32 = vcombine.high %v2344_v6, %v2352_v22  ;;  %v2386_v33 = vcombine.high %v2360_v24, %v2368_v26 }
 0xc3e   : > { %v2191_v34 = vcombine.low %v2163_v27, %v2170_v28  ;;  %v3666_v35 = vcombine.high %v2163_v27, %v2170_v28  ;;  %v2207_v41 = vcombine.low %v2179_v29, %v2186_v30  ;;  %v3667_v42 = vcombine.high %v2179_v29, %v2186_v30 }
 0xc3f   : > { %v2377_v36 = vrot.slane %v2369_v31, %v4440_v57  ;;  %v2393_v38 = vrot.slane %v2385_v0, %v4440_v57  ;;  %v2384_v47 = vrot.slane %v2370_v32, %v4440_v57  ;;  %v2400_v48 = vrot.slane %v2386_v33, %v4440_v57 }
 0xc40   : > { %v2198_v39 = vrot.slane %v2191_v34, %v4437_v51  ;;  %v2206_v40 = vrot.slane %v3666_v35, %v4437_v51  ;;  %v2214_v43 = vrot.slane %v2207_v41, %v4437_v51  ;;  %v2222_v44 = vrot.slane %v3667_v42, %v4437_v51 }
 0xc41   : > { %v2401_v45 = vcombine.low %v2377_v36, %v2393_v38  ;;  %v2402_v46 = vcombine.high %v2377_v36, %v2393_v38  ;;  %v2403_v61 = vcombine.low %v2384_v47, %v2400_v48  ;;  %v2404_v25 = vcombine.high %v2384_v47, %v2400_v48 }
 0xc42   : > { %v2223_v49 = vcombine.low %v2198_v39, %v2206_v40  ;;  %v2239_v50 = vcombine.low %v2214_v43, %v2222_v44  ;;  %v2224_v62 = vcombine.high %v2198_v39, %v2206_v40  ;;  %v2240_v63 = vcombine.high %v2214_v43, %v2222_v44  ;;  %v3662_v39 = vld [vmem:[%s5019_s3 + $0x6] ss:$0 sm:$0xff] }
 0xc43   : > { %v2555_v52 = vpack.c.bf16 %v2401_v45, %v2401_v45  ;;  %v2556_v53 = vpack.c.bf16 %v2402_v46, %v2402_v46  ;;  %v2557_v4 = vpack.c.bf16 %v2403_v61, %v2403_v61  ;;  %v2558_v59 = vpack.c.bf16 %v2404_v25, %v2404_v25 }
 0xc44   : > { %v2231_v54 = vrot.slane %v2223_v49, %v4440_v57  ;;  %v2247_v55 = vrot.slane %v2239_v50, %v4440_v57  ;;  %v2238_v8 = vrot.slane %v2224_v62, %v4440_v57  ;;  %v2254_v10 = vrot.slane %v2240_v63, %v4440_v57 }
 0xc45   : > { %v2563_v56 = vsel %vm1052_vm3, %v2555_v52, 0  ;;  %v2609_v58 = vsel %vm1052_vm3, %v2556_v53, 0  ;;  %v2655_v11 = vsel %vm1052_vm3, %v2557_v4, 0  ;;  %v2701_v12 = vsel %vm1052_vm3, %v2558_v59, 0 }
 0xc46   : > { %3957 = vmatpush3.bf16.xpose.msra.mxu0 %v2563_v56  ;;  %3963 = vmatpush3.bf16.xpose.msra.mxu1 %v2609_v58  ;;  %v2255_v1 = vcombine.low %v2231_v54, %v2247_v55  ;;  %v2256_v3 = vcombine.high %v2231_v54, %v2247_v55  ;;  %v2257_v13 = vcombine.low %v2238_v8, %v2254_v10 }
 0xc47   : > { %3968 = vmatprep.subr.bf16.mxu0 %v4240_v9  ;;  %3974 = vmatprep.subr.bf16.mxu1 %v4240_v9  ;;  %v2258_v14 = vcombine.high %v2238_v8, %v2254_v10  ;;  %v2108_v40 = vadd.f32 %v3662_v39, %v4726_v37 }
 0xc48   : > { %v2551_v60 = vpack.c.bf16 %v2255_v1, %v2255_v1  ;;  %v2552_v7 = vpack.c.bf16 %v2256_v3, %v2256_v3  ;;  %v2553_v15 = vpack.c.bf16 %v2257_v13, %v2257_v13 }
 0xc49   : > { %v2554_v16 = vpack.c.bf16 %v2258_v14, %v2258_v14 }
 0xc4d   : > { %3959 = vmatmul.mubr.msk.bf16.vlgmr.msra.gmra.mxu0 %vm1052_vm3, %v2551_v60  ;;  %3965 = vmatmul.mubr.msk.bf16.vlgmr.msra.gmra.mxu1 %vm1052_vm3, %v2552_v7 }
 0xc4e   : > { %3969 = vmatpush3.bf16.xpose.msra.mxu0 %v2655_v11  ;;  %3975 = vmatpush3.bf16.xpose.msra.mxu1 %v2701_v12 }
 0xc4f   : > { %3970 = vmatprep.mubr.msk.bf16.mxu0 %vm4241_vm1, %v4240_v9  ;;  %3976 = vmatprep.mubr.msk.bf16.mxu1 %vm4241_vm1, %v4240_v9 }
 0xc50   : > { %3980 = vmatprep.subr.bf16.mxu0 %v4240_v9  ;;  %3986 = vmatprep.subr.bf16.mxu1 %v4240_v9 }
 0xc55   : > { %3971 = vmatmul.mubr.msk.bf16.vlgmr.msra.gmra.mxu0 %vm1052_vm3, %v2553_v15  ;;  %3977 = vmatmul.mubr.msk.bf16.vlgmr.msra.gmra.mxu1 %vm1052_vm3, %v2554_v16 }
 0xc56   : > { %3982 = vmatprep.mubr.msk.bf16.mxu0 %vm4241_vm1, %v4240_v9  ;;  %3988 = vmatprep.mubr.msk.bf16.mxu1 %vm4241_vm1, %v4240_v9 }
 0xd0d   : > { %v2599_v17 = vpop.f32.mrf.mxu0  ;;  %v2645_v18 = vpop.f32.mrf.mxu1 }
 0xd0e   : > { %v2600_v19 = vadd.f32 %v2599_v17, %v4497_v23  ;;  %v2646_v20 = vadd.f32 %v2645_v18, %v4497_v23 }
 0xd0f   : > { %v3960_v5 = vpop.f32.mrf.mxu0  ;;  %v3966_v21 = vpop.f32.mrf.mxu1 }
 0xd10   : > { %v2743_v6 = vsel %vm1052_vm3, %v2600_v19, -inf  ;;  %v2746_v22 = vsel %vm1052_vm3, %v2646_v20, -inf }
 0xd11   : > { %2744 = vmax.xlane.f32.xlu1 %v2743_v6  ;;  %v2602_v24 = vpop.f32.mrf.mxu0  ;;  %2747 = vmax.xlane.f32.xlu0 %v2746_v22  ;;  %v2648_v26 = vpop.f32.mrf.mxu1 }
 0xd13   : > { %v3961_v27 = vpop.f32.mrf.mxu0  ;;  %v3967_v28 = vpop.f32.mrf.mxu1 }
 0xd15   : > { %v2691_v29 = vpop.f32.mrf.mxu0  ;;  %v2737_v30 = vpop.f32.mrf.mxu1 }
 0xd16   : > { %v2692_v31 = vadd.f32 %v2691_v29, %v4497_v23  ;;  %v2738_v0 = vadd.f32 %v2737_v30, %v4497_v23 }
 0xd17   : > { %v3972_v32 = vpop.f32.mrf.mxu0  ;;  %v3978_v33 = vpop.f32.mrf.mxu1 }
 0xd18   : > { %v2749_v34 = vsel %vm1052_vm3, %v2692_v31, -inf  ;;  %v2752_v35 = vsel %vm1052_vm3, %v2738_v0, -inf }
 0xd19   : > { %v2694_v41 = vpop.f32.mrf.mxu0  ;;  %2750 = vmax.xlane.f32.xlu0 %v2749_v34  ;;  %2753 = vmax.xlane.f32.xlu1 %v2752_v35  ;;  %v2740_v42 = vpop.f32.mrf.mxu1 }
 0xd1b   : > { %v3973_v36 = vpop.f32.mrf.mxu0  ;;  %v3979_v38 = vpop.f32.mrf.mxu1 }
 0xd2a   : > { %2409 = vrot.lane.b32.xlu1 %v2108_v40, %s4244_s22 }
 0xd9a   : > { %v2745_v23 = vpop.xlane.xlu1 %2744  ;;  %v2748_v43 = vpop.xlane.xlu0 %2747 }
 0xd9b   : > { %v2755_v44 = vsub.f32 %v2600_v19, %v2745_v23  ;;  %v2756_v45 = vsub.f32 %v2646_v20, %v2748_v43 }
 0xd9d   : > { %v2759_v46 = vmul.f32 1.442695, %v2755_v44  ;;  %v2761_v47 = vmul.f32 1.442695, %v2756_v45 }
 0xd9f   : > { %4158 = vpow2.f32 %v2759_v46 }
 0xda0   : > { %4160 = vpow2.f32 %v2761_v47 }
 0xda2   : > { %v2751_v52 = vpop.xlane.xlu0 %2750  ;;  %v2754_v53 = vpop.xlane.xlu1 %2753 }
 0xda3   : > { %v2757_v54 = vsub.f32 %v2692_v31, %v2751_v52  ;;  %v2758_v55 = vsub.f32 %v2738_v0, %v2754_v53 }
 0xda5   : > { %v2763_v56 = vmul.f32 1.442695, %v2757_v54  ;;  %v2765_v58 = vmul.f32 1.442695, %v2758_v55 }
 0xda6   : > { %v2410_v1 = vpop.permute.xlu1 %2409 }
 0xda7   : > { %4162 = vpow2.f32 %v2763_v56  ;;  %v2415_v59 = vcombine.low %v2108_v40, %v2410_v1  ;;  %v2416_v60 = vcombine.high %v2108_v40, %v2410_v1 }
 0xda8   : > { %4164 = vpow2.f32 %v2765_v58 }
 0xda9   : > { %v2423_v12 = vrot.slane %v2415_v59, %v4437_v51  ;;  %v2430_v13 = vrot.slane %v2416_v60, %v4437_v51 }
 0xdac   : > { %v4795_v48 = vpop.eup %4158 }
 0xdad   : > { %v4797_v49 = vpop.eup %4160  ;;  %v2767_v50 = vsel %vm1052_vm3, %v4795_v48, 0.0 }
 0xdae   : > { %2768 = vadd.xlane.f32.xlu0 %v2767_v50  ;;  %v2770_v37 = vsel %vm1052_vm3, %v4797_v49, 0.0 }
 0xdaf   : > { %2771 = vadd.xlane.f32.xlu1 %v2770_v37 }
 0xdb4   : > { %v4805_v61 = vpop.eup %4162 }
 0xdb5   : > { %v4807_v25 = vpop.eup %4164  ;;  %v2773_v62 = vsel %vm1052_vm3, %v4805_v61, 0.0 }
 0xdb6   : > { %v2776_v63 = vsel %vm1052_vm3, %v4807_v25, 0.0 }
 0xdc0   : > { %2412 = vrot.lane.b32.xlu1 %v2108_v40, %s5037_s12 }
 0xdc4   : > { %2406 = vrot.lane.b32.xlu0 %v2108_v40, %s4243_s14 }
 0xde3   : > { %2774 = vadd.xlane.f32.xlu0 %v2773_v62 }
 0xde4   : > { %2777 = vadd.xlane.f32.xlu1 %v2776_v63 }
 0xe37   : > { %v2769_v3 = vpop.xlane.xlu0 %2768 }
 0xe38   : > { %v2772_v4 = vpop.xlane.xlu1 %2771  ;;  %4166 = vrcp.f32 %v2769_v3 }
 0xe39   : > { %4168 = vrcp.f32 %v2772_v4 }
 0xe3b   : > { %v2407_v7 = vpop.permute.xlu0 %2406 }
 0xe3c   : > { %v2413_v8 = vpop.permute.xlu1 %2412 }
 0xe3d   : > { %v2431_v10 = vcombine.low %v2407_v7, %v2413_v8  ;;  %v2432_v11 = vcombine.high %v2407_v7, %v2413_v8 }
 0xe3f   : > { %v2439_v14 = vrot.slane %v2431_v10, %v4437_v51  ;;  %v2446_v15 = vrot.slane %v2432_v11, %v4437_v51 }
 0xe41   : > { %v2447_v16 = vcombine.low %v2423_v12, %v2439_v14  ;;  %v2448_v17 = vcombine.high %v2423_v12, %v2439_v14  ;;  %v2463_v18 = vcombine.low %v2430_v13, %v2446_v15  ;;  %v2464_v19 = vcombine.high %v2430_v13, %v2446_v15 }
 0xe43   : > { %v2455_v20 = vrot.slane %v2447_v16, %v4440_v57  ;;  %v2462_v5 = vrot.slane %v2448_v17, %v4440_v57  ;;  %v2471_v21 = vrot.slane %v2463_v18, %v4440_v57  ;;  %v2478_v6 = vrot.slane %v2464_v19, %v4440_v57 }
 0xe45   : > { %v2483_v22 = vcombine.low %v2455_v20, %v2462_v5  ;;  %v3670_v24 = vcombine.high %v2455_v20, %v2462_v5  ;;  %v2499_v26 = vcombine.low %v2471_v21, %v2478_v6  ;;  %v3671_v27 = vcombine.high %v2471_v21, %v2478_v6  ;;  %v4167_v35 = vpop.eup %4166 }
 0xe46   : > { %v4169_v39 = vpop.eup %4168  ;;  %v2783_v47 = vmul.f32 %v4167_v35, %v4795_v48 }
 0xe47   : > { %v2490_v28 = vrot.slane %v2483_v22, %v4437_v51  ;;  %v2498_v29 = vrot.slane %v3670_v24, %v4437_v51  ;;  %v2506_v30 = vrot.slane %v2499_v26, %v4437_v51  ;;  %v2514_v31 = vrot.slane %v3671_v27, %v4437_v51 }
 0xe48   : > { %v2784_v50 = vmul.f32 %v4169_v39, %v4797_v49  ;;  %v2787_v55 = vpack.c.bf16 %v2783_v47, %v2783_v47 }
 0xe49   : > { %v2515_v0 = vcombine.low %v2490_v28, %v2498_v29  ;;  %v2531_v32 = vcombine.low %v2506_v30, %v2514_v31  ;;  %v2516_v33 = vcombine.high %v2490_v28, %v2498_v29  ;;  %v2532_v34 = vcombine.high %v2506_v30, %v2514_v31 }
 0xe4a   : > { %v2788_v56 = vpack.c.bf16 %v2784_v50, %v2784_v50 }
 0xe4b   : > { %v2523_v41 = vrot.slane %v2515_v0, %v4440_v57  ;;  %v2539_v42 = vrot.slane %v2531_v32, %v4440_v57  ;;  %v2530_v36 = vrot.slane %v2516_v33, %v4440_v57  ;;  %v2546_v38 = vrot.slane %v2532_v34, %v4440_v57  ;;  %v4122_v32 = vld [vmem:[%s5020_s4 + $0x18] sm:$0xff]  }
 0xe4d   : > { %v2547_v40 = vcombine.low %v2523_v41, %v2539_v42  ;;  %v2548_v23 = vcombine.high %v2523_v41, %v2539_v42  ;;  %v2549_v43 = vcombine.low %v2530_v36, %v2546_v38  ;;  %v2550_v44 = vcombine.high %v2530_v36, %v2546_v38 }
 0xe4f   : > { %v2791_v45 = vpack.c.bf16 %v2547_v40, %v2547_v40  ;;  %v2792_v46 = vpack.c.bf16 %v2548_v23, %v2548_v23  ;;  %v2793_v53 = vpack.c.bf16 %v2549_v43, %v2549_v43  ;;  %v2794_v54 = vpack.c.bf16 %v2550_v44, %v2550_v44  ;;  %v4123_v23 = vld [vmem:[%s5020_s4 + $0x10] sm:$0xff]  }
 0xe51   : > { %v2799_v37 = vsel %vm1292_vm4, %v2791_v45, 0  ;;  %v2845_v52 = vsel %vm1292_vm4, %v2792_v46, 0  ;;  %v2891_v48 = vsel %vm1292_vm4, %v2793_v53, 0  ;;  %v2937_v49 = vsel %vm1292_vm4, %v2794_v54, 0 }
 0xe52   : > { %3981 = vmatpush3.bf16.msra.mxu0 %v2799_v37  ;;  %3987 = vmatpush3.bf16.msra.mxu1 %v2845_v52 }
 0xe53   : > { %3992 = vmatprep.subr.bf16.mxu0 %v4240_v9  ;;  %3998 = vmatprep.subr.bf16.mxu1 %v4240_v9 }
 0xe55   : > { %3983 = vmatmul.mubr.msk.bf16.vlgmr.msra.gmra.mxu0 %vm1052_vm3, %v2787_v55  ;;  %3989 = vmatmul.mubr.msk.bf16.vlgmr.msra.gmra.mxu1 %vm1052_vm3, %v2788_v56 }
 0xe56   : > { %3993 = vmatpush3.bf16.msra.mxu0 %v2891_v48  ;;  %3999 = vmatpush3.bf16.msra.mxu1 %v2937_v49 }
 0xe57   : > { %3994 = vmatprep.mubr.msk.bf16.mxu0 %vm4241_vm1, %v4240_v9  ;;  %4000 = vmatprep.mubr.msk.bf16.mxu1 %vm4241_vm1, %v4240_v9 }
 0xe58   : > { %4004 = vmatprep.subr.bf16.mxu0 %v4240_v9  ;;  %4012 = vmatprep.subr.bf16.mxu1 %v4240_v9 }
 0xe6c   : > { %v2775_v58 = vpop.xlane.xlu0 %2774 }
 0xe6d   : > { %4170 = vrcp.f32 %v2775_v58  ;;  %v2778_v62 = vpop.xlane.xlu1 %2777 }
 0xe6e   : > { %4172 = vrcp.f32 %v2778_v62 }
 0xe7a   : > { %v4171_v63 = vpop.eup %4170 }
 0xe7b   : > { %v4173_v1 = vpop.eup %4172  ;;  %v2785_v3 = vmul.f32 %v4171_v63, %v4805_v61 }
 0xe7c   : > { %v2786_v4 = vmul.f32 %v4173_v1, %v4807_v25 }
 0xe7d   : > { %v2789_v59 = vpack.c.bf16 %v2785_v3, %v2785_v3 }
 0xe7e   : > { %v2790_v60 = vpack.c.bf16 %v2786_v4, %v2786_v4 }
 0xe7f   : > { %3995 = vmatmul.mubr.msk.bf16.vlgmr.msra.gmra.mxu0 %vm1052_vm3, %v2789_v59 }
 0xe80   : > { %4001 = vmatmul.mubr.msk.bf16.vlgmr.msra.gmra.mxu1 %vm1052_vm3, %v2790_v60  ;;  %4008 = vmatprep.mubr.msk.bf16.mxu0 %vm4241_vm1, %v4240_v9  ;;  %v3687_v60 = vld [vmem:[%s5021_s5 + $0x2] ss:$0 sm:$0xff] }
 0xe81   : > { %4016 = vmatprep.mubr.msk.bf16.mxu1 %vm4241_vm1, %v4240_v9  ;;  %4005 = vmatpush3.bf16.msra.mxu0 %v4122_v32 }
 0xe82   : > { %4006 = vmatprep.subr.bf16.mxu0 %v4240_v9 }
 0xe85   : > { %4007 = vmatpush3.bf16.msra.mxu0 %v4123_v23 }
 0xe86   : > { %4020 = vmatprep.subr.bf16.mxu0 %v4240_v9 }
 0xf15   : > { %v2835_v7 = vpop.f32.mrf.mxu0  ;;  %v2881_v8 = vpop.f32.mrf.mxu1 }
 0xf17   : > { %v3984_v10 = vpop.f32.mrf.mxu0  ;;  %v3990_v11 = vpop.f32.mrf.mxu1 }
 0xf19   : > { %v2838_v12 = vpop.f32.mrf.mxu0  ;;  %v2884_v61 = vpop.f32.mrf.mxu1 }
 0xf1b   : > { %v3985_v13 = vpop.f32.mrf.mxu0  ;;  %v3991_v25 = vpop.f32.mrf.mxu1 }
 0xf3f   : > { %v2927_v14 = vpop.f32.mrf.mxu0 }
 0xf40   : > { %v2979_v15 = vcombine.low %v2835_v7, %v2927_v14  ;;  %v2980_v16 = vcombine.high %v2835_v7, %v2927_v14  ;;  %v2973_v17 = vpop.f32.mrf.mxu1 }
 0xf41   : > { %v2995_v18 = vcombine.low %v2881_v8, %v2973_v17  ;;  %v2996_v19 = vcombine.high %v2881_v8, %v2973_v17  ;;  %v3996_v20 = vpop.f32.mrf.mxu0 }
 0xf42   : > { %v2987_v5 = vrot.slane %v2979_v15, %v4437_v51  ;;  %v2994_v21 = vrot.slane %v2980_v16, %v4437_v51  ;;  %v4002_v6 = vpop.f32.mrf.mxu1  ;;  %v4127_v20 = vld [vmem:[%s5024_s8 + $0x70] sm:$0xff]  }
 0xf43   : > { %v3003_v22 = vrot.slane %v2995_v18, %v4437_v51  ;;  %v3010_v24 = vrot.slane %v2996_v19, %v4437_v51  ;;  %v2930_v26 = vpop.f32.mrf.mxu0  ;;  %v4124_v18 = vld [vmem:[%s5022_s6 + $0x18] sm:$0xff]  }
 0xf44   : > { %v2976_v27 = vpop.f32.mrf.mxu1  ;;  %4013 = vmatpush3.bf16.msra.mxu1 %v4124_v18  ;;  %v4126_v19 = vld [vmem:[%s5024_s8 + $0x78] sm:$0xff]  }
 0xf45   : > { %v3011_v28 = vcombine.low %v2987_v5, %v3003_v22  ;;  %v3012_v29 = vcombine.high %v2987_v5, %v3003_v22  ;;  %v3027_v30 = vcombine.low %v2994_v21, %v3010_v24  ;;  %v3028_v31 = vcombine.high %v2994_v21, %v3010_v24  ;;  %v3997_v0 = vpop.f32.mrf.mxu0  ;;  %4014 = vmatprep.subr.bf16.mxu1 %v4240_v9  ;;  %v4128_v5 = vld [vmem:[%s5024_s8 + $0x68] sm:$0xff]   ;;  %v4129_v21 = vld [vmem:[%s5024_s8 + $0x60] sm:$0xff]   ;;  %v4130_v6 = vld [vmem:[%s5024_s8 + $0x58] sm:$0xff]  }
 0xf46   : > { %v4003_v33 = vpop.f32.mrf.mxu1  ;;  %v4131_v22 = vld [vmem:[%s5024_s8 + $0x50] sm:$0xff]  }
 0xf47   : > { %v3019_v34 = vrot.slane %v3011_v28, %v4440_v57  ;;  %v3026_v35 = vrot.slane %v3012_v29, %v4440_v57  ;;  %v3035_v41 = vrot.slane %v3027_v30, %v4440_v57  ;;  %v3042_v42 = vrot.slane %v3028_v31, %v4440_v57  ;;  %v3693_v29 = vld [vmem:[%s5017_s1 + $0x6] ss:$0 sm:$0xff]  ;;  %v3694_v31 = vld [vmem:[%s5017_s1 + $0x7] ss:$0 sm:$0xff] }
 0xf49   : > { %v3047_v36 = vcombine.low %v3019_v34, %v3026_v35  ;;  %v3680_v38 = vcombine.high %v3019_v34, %v3026_v35  ;;  %v3063_v39 = vcombine.low %v3035_v41, %v3042_v42  ;;  %v3681_v40 = vcombine.high %v3035_v41, %v3042_v42  ;;  %v4132_v34 = vld [vmem:[%s5024_s8 + $0x48] sm:$0xff]   ;;  %v4133_v35 = vld [vmem:[%s5024_s8 + $0x40] sm:$0xff]  }
 0xf4a   : > { %v3699_v41 = vld [vmem:[%s5023_s7 + $0x1] ss:$0 sm:$0xff] }
 0xf4b   : > { %v3054_v43 = vrot.slane %v3047_v36, %v4437_v51  ;;  %v3062_v44 = vrot.slane %v3680_v38, %v4437_v51  ;;  %v3070_v45 = vrot.slane %v3063_v39, %v4437_v51  ;;  %v3078_v46 = vrot.slane %v3681_v40, %v4437_v51 }
 0xf4d   : > { %v3080_v47 = vcombine.high %v3054_v43, %v3062_v44  ;;  %v3096_v50 = vcombine.high %v3070_v45, %v3078_v46  ;;  %v3079_v37 = vcombine.low %v3054_v43, %v3062_v44  ;;  %v3095_v52 = vcombine.low %v3070_v45, %v3078_v46  ;;  %v3720_v44 = vld [vmem:[%s5021_s5 + $0x3] ss:$0 sm:$0xff] }
 0xf4f   : > { %v3094_v53 = vrot.slane %v3080_v47, %v4440_v57  ;;  %v3110_v54 = vrot.slane %v3096_v50, %v4440_v57  ;;  %v3087_v55 = vrot.slane %v3079_v37, %v4440_v57  ;;  %v3103_v56 = vrot.slane %v3095_v52, %v4440_v57 }
 0xf51   : > { %v3113_v48 = vcombine.low %v3094_v53, %v3110_v54  ;;  %v3112_v49 = vcombine.high %v3087_v55, %v3103_v56  ;;  %v3111_v58 = vcombine.low %v3087_v55, %v3103_v56  ;;  %v3114_v51 = vcombine.high %v3094_v53, %v3110_v54 }
 0xf53   : > { %3120 = vrot.lane.b32.xlu1 %v3113_v48, %s5038_s13  ;;  %3116 = vrot.lane.b32.xlu0 %v3112_v49, %s5039_s16  ;;  %s375_s16 = sand.u32 1, %s4230_s18   ;;  %s4975_s13 = scalar_lea.hbm %s5027_s11, %s3738_s29 }
 0xf54   : > { %s3498_s12 = scalar_lea.sflag [#allocation3], %s375_s16 }
 0xf57   : > { %3124 = vrot.lane.b32.xlu0 %v3114_v51, %s5040_s25  ;;  %v4135_v51 = vld [vmem:[%s5025_s9] sm:$0xff]   ;;  %s3574_s25 = sshll.u32 %s375_s16, 3 }
 0xf58   : > { %s377_s14 = scalar_lea.vmem [#allocation2], %s3574_s25  ;;  %s4182_s25 = sshll.u32 %s4251_s21, 4  ;;  %s4183_s25 = int_to_ptr.vmem [resolvable:$false] %s4182_s25 }
 0xf59   : > { %s3511_s22 = sshll.u32 %s377_s14, 4  ;;  %s4184_s30 = scalar_lea.vmem %s4183_s25, 256  ;;  %s4977_s22 = int_to_ptr.vmem [resolvable:$true] %s3511_s22 }
 0xf5a   : > { %s4178_s15 = scalar_lea.vmem %s4977_s22, 128  ;;  %p4185_p0 = scmp.lt.s32.totalorder %s4977_s22, %s4183_s25 }
 0xf5b   : > { %p4179_p11 = scmp.ne.s32.totalorder %s4977_s22, %s4178_s15  ;;  %p4186_p1 = scmp.lt.s32.totalorder %s4184_s30, %s4178_s15 }
 0xf5d   : > { %p4180_p12 = pnand %p4179_p11, %p4350_p5  ;;  %p4187_p2 = por %p4186_p1, %p4185_p0 }
 0xf5f   : > { %p4181_p13 = pneg %p4180_p12 }
 0xf61   : > { %p4188_p3 = pnand %p4187_p2, %p4181_p13 }
 0xfc5   : > { %v3117_v62 = vpop.permute.xlu0 %3116  ;;  %v3121_v63 = vpop.permute.xlu1 %3120 }
 0xfc6   : > { %v3127_v1 = vsel %vm1052_vm3, %v3111_v58, %v3117_v62  ;;  %v4134_v58 = vld [vmem:[%s5025_s9 + $0x8] sm:$0xff]  }
 0xfc7   : > { %v3128_v4 = vsel %vm1623_vm5, %v3127_v1, %v3121_v63 }
 0xfc9   : > { %v3125_v3 = vpop.permute.xlu0 %3124 }
 0xfca   : > { %v3129_v59 = vsel %vm1625_vm6, %v3128_v4, %v3125_v3  ;;  %v3731_v4 = vld [vmem:[%s5017_s1 + $0x8] ss:$0 sm:$0xff] }
 0xfcb   : > { %v3130_v57 = vpack.c.bf16 %v3129_v59, %v3129_v59 }
 0xfcd   : > { %4009 = vmatmul.mubr.msk.bf16.vlgmr.msra.gmra.mxu0 %vm392_vm0, %v3130_v57  ;;  %v3732_v57 = vld [vmem:[%s5017_s1 + $0x9] ss:$0 sm:$0xff] }
 0xfce   : > { %4036 = vmatprep.mubr.msk.bf16.mxu0 %vm4241_vm1, %v4240_v9  ;;  %4021 = vmatpush3.bf16.msra.mxu0 %v4126_v19 }
 0xfcf   : > { %4022 = vmatprep.subr.bf16.mxu0 %v4240_v9 }
 0xfd2   : > { %4023 = vmatpush3.bf16.msra.mxu0 %v4127_v20 }
 0xfd3   : > { %4024 = vmatprep.subr.bf16.mxu0 %v4240_v9 }
 0xfd6   : > { %4025 = vmatpush3.bf16.msra.mxu0 %v4128_v5 }
 0xfd7   : > { %4026 = vmatprep.subr.bf16.mxu0 %v4240_v9 }
 0xfda   : > { %4027 = vmatpush3.bf16.msra.mxu0 %v4129_v21 }
 0xfdb   : > { %4028 = vmatprep.subr.bf16.mxu0 %v4240_v9 }
 0xfde   : > { %4029 = vmatpush3.bf16.msra.mxu0 %v4130_v6 }
 0xfdf   : > { %4030 = vmatprep.subr.bf16.mxu0 %v4240_v9 }
 0xfe2   : > { %4031 = vmatpush3.bf16.msra.mxu0 %v4131_v22 }
 0xfe3   : > { %4032 = vmatprep.subr.bf16.mxu0 %v4240_v9 }
 0xfe6   : > { %4033 = vmatpush3.bf16.msra.mxu0 %v4132_v34 }
 0xfe7   : > { %4034 = vmatprep.subr.bf16.mxu0 %v4240_v9 }
 0xfea   : > { %4035 = vmatpush3.bf16.msra.mxu0 %v4133_v35 }
0x108d   : > { %v3191_v7 = vpop.f32.mrf.mxu0 }
0x108e   : > { %v3192_v8 = vadd.f32 %v3687_v60, %v3191_v7 }
0x108f   : > { %v4010_v10 = vpop.f32.mrf.mxu0 }
0x1090   : > { %v4890_v11 = vadd.f32 %v3192_v8, %v4671_v2  ;;  %v4125_v2 = vld [vmem:[%s5022_s6 + $0x10] sm:$0xff]  }
0x1091   : > { %v3194_v12 = vpop.f32.mrf.mxu0  ;;  %4015 = vmatpush3.bf16.msra.mxu1 %v4125_v2 }
0x1092   : > { %v3201_v61 = vsel %vm392_vm0, %v4890_v11, 0.0  ;;  %4040 = vmatprep.subr.bf16.mxu1 %v4240_v9 }
0x1093   : > { %3202 = vadd.xlane.f32.xlu1 %v3201_v61  ;;  %v4011_v13 = vpop.f32.mrf.mxu0 }
0x111c   : > { %v3203_v25 = vpop.xlane.xlu1 %3202 }
0x111d   : > { %v3204_v14 = vmul.f32 0.03125, %v3203_v25 }
0x111f   : > { %v3205_v15 = vsub.f32 %v4890_v11, %v3204_v14 }
0x1121   : > { %v3206_v16 = vmul.f32 %v3205_v15, %v3205_v15 }
0x1123   : > { %v3207_v17 = vsel %vm392_vm0, %v3206_v16, 0.0 }
0x1124   : > { %3208 = vadd.xlane.f32.xlu0 %v3207_v17 }
0x11ad   : > { %v3209_v24 = vpop.xlane.xlu0 %3208 }
0x11ae   : > { %v3210_v26 = vmul.f32 0.03125, %v3209_v24 }
0x11b0   : > { %v3211_v27 = vadd.f32 1e-05, %v3210_v26 }
0x11b2   : > { %4174 = vrsqrt.f32 %v3211_v27 }
0x11bf   : > { %v4175_v28 = vpop.eup %4174 }
0x11c0   : > { %v3213_v30 = vmul.f32 %v4175_v28, %v3205_v15 }
0x11c2   : > { %v3218_v0 = vmul.f32 %v3693_v29, %v3213_v30 }
0x11c4   : > { %v3223_v32 = vadd.f32 %v3694_v31, %v3218_v0 }
0x11c6   : > { %v3224_v33 = vpack.c.bf16 %v3223_v32, %v3223_v32 }
0x11c8   : > { %4017 = vmatmul.mubr.msk.bf16.vlgmr.msra.gmra.mxu1 %vm392_vm0, %v3224_v33 }
0x11c9   : > { %4044 = vmatprep.mubr.msk.bf16.mxu1 %vm4241_vm1, %v4240_v9  ;;  %4041 = vmatpush3.bf16.msra.mxu1 %v4134_v58 }
0x11ca   : > { %4042 = vmatprep.subr.bf16.mxu1 %v4240_v9  ;;  %v3733_v9 = vld [vmem:[%s5026_s10] ss:$0 sm:$0xff] }
0x11cd   : > { %4043 = vmatpush3.bf16.msra.mxu1 %v4135_v51 }
0x1288   : > { %v3284_v42 = vpop.f32.mrf.mxu1 }
0x1289   : > { %v3285_v36 = vadd.f32 %v3699_v41, %v3284_v42 }
0x128a   : > { %v4018_v38 = vpop.f32.mrf.mxu1 }
0x128b   : > { %v3290_v39 = vmax.f32 %v3285_v36, 0.0 }
0x128c   : > { %v3287_v40 = vpop.f32.mrf.mxu1 }
0x128d   : > { %v3291_v23 = vpack.c.bf16 %v3290_v39, %v3290_v39 }
0x128e   : > { %v4019_v43 = vpop.f32.mrf.mxu1 }
0x128f   : > { %4037 = vmatmul.mubr.bf16.vlgmr.msra.gmra.mxu0 %v3291_v23 }
0x134f   : > { %v3396_v45 = vpop.f32.mrf.mxu0 }
0x1350   : > { %v3397_v46 = vadd.f32 %v3720_v44, %v3396_v45 }
0x1351   : > { %v4038_v47 = vpop.f32.mrf.mxu0 }
0x1352   : > { %v3402_v50 = vadd.f32 %v3397_v46, %v4890_v11 }
0x1353   : > { %v3399_v37 = vpop.f32.mrf.mxu0 }
0x1354   : > { %v3406_v52 = vsel %vm392_vm0, %v3402_v50, 0.0 }
0x1355   : > { %3407 = vadd.xlane.f32.xlu0 %v3406_v52  ;;  %v4039_v53 = vpop.f32.mrf.mxu0 }
0x13de   : > { %v3408_v54 = vpop.xlane.xlu0 %3407 }
0x13df   : > { %v3409_v55 = vmul.f32 0.03125, %v3408_v54 }
0x13e1   : > { %v3410_v56 = vsub.f32 %v3402_v50, %v3409_v55 }
0x13e3   : > { %v3411_v48 = vmul.f32 %v3410_v56, %v3410_v56 }
0x13e5   : > { %v3412_v49 = vsel %vm392_vm0, %v3411_v48, 0.0 }
0x13e6   : > { %3413 = vadd.xlane.f32.xlu1 %v3412_v49 }
0x146f   : > { %v3414_v62 = vpop.xlane.xlu1 %3413 }
0x1470   : > { %v3415_v63 = vmul.f32 0.03125, %v3414_v62 }
0x1472   : > { %v3416_v1 = vadd.f32 1e-05, %v3415_v63 }
0x1474   : > { %4176 = vrsqrt.f32 %v3416_v1 }
0x1481   : > { %v4177_v3 = vpop.eup %4176 }
0x1482   : > { %v3418_v59 = vmul.f32 %v4177_v3, %v3410_v56 }
0x1484   : > { %v3423_v60 = vmul.f32 %v3731_v4, %v3418_v59 }
0x1486   : > { %v3428_v7 = vadd.f32 %v3732_v57, %v3423_v60 }
0x1488   : > { %v3429_v8 = vpack.c.bf16 %v3428_v7, %v3428_v7 }
0x148a   : > { %4045 = vmatmul.mubr.msk.bf16.vlgmr.msra.gmra.mxu1 %vm392_vm0, %v3429_v8 }
0x154a   : > { %v3490_v10 = vpop.f32.mrf.mxu1 }
0x154b   : > { %v3491_v11 = vadd.f32 %v3733_v9, %v3490_v10 }
0x154c   : > { %v4046_v12 = vpop.f32.mrf.mxu1 }
0x154d   : > { %3496 = vst [vmem:[%s377_s14] sm:$0xff] %v3491_v11 }
0x154e   : > { %v3493_v61 = vpop.f32.mrf.mxu1 }
0x154f   : > { %4191 = shalt.err (!%p4188_p3)
}
0x1550   : > { %s4192_s29 = scalar_lea.hbm %s4975_s13, 128  ;;  %s4196_s24 = scalar_lea.hbm %s5027_s11, 256 }
0x1551   : > { %p4193_p4 = scmp.ne.s32.totalorder %s4975_s13, %s4192_s29  ;;  %p4197_p9 = scmp.lt.s32.totalorder %s4975_s13, %s5027_s11 }
0x1552   : > { %p4198_p10 = scmp.lt.s32.totalorder %s4196_s24, %s4192_s29 }
0x1553   : > { %p4194_p7 = pnand %p4193_p4, %p4350_p5 }
0x1554   : > { %p4199_p11 = por %p4198_p10, %p4197_p9 }
0x1555   : > { %p4195_p8 = pneg %p4194_p7 }
0x1557   : > { %p4200_p12 = pnand %p4199_p11, %p4195_p8 }
0x1559   : > { %4203 = shalt.err (!%p4200_p12)
}
0x155a   : > { %4048 = dma.vmem_to_hbm [thread:$0]  (%p4350_p5), %s4977_s22, 128, %s4975_s13, %s3498_s12   ;;  %v4047_v13 = vpop.f32.mrf.mxu1 }
0x155b PF: > { %p4054_p13 = scmp.ge.s32.totalorder %s4238_s20, 2  ;;  %s3523_s15 = sand.u32 1, %s4226_s17  }
0x155c   : > { %s3524_s0 = scalar_lea.sflag [#allocation3], %s3523_s15 }
0x155d   : > { %p4051_p0 = pnand %p4054_p13, %p4354_p6 }
0x155f   : > { %p4052_p1 = pneg %p4051_p0 }
0x1561   : > { %4221 = dma.done.wait (%p4052_p1), %s3524_s0, 128  }
0x1562   : > { %4223 = vsyncadd (%p4052_p1), %s3524_s0, 4294967168  ;;  %p21_p2 = scmp.ge.s32.totalorder %s4337_s23, 4   ;;  %s5041_s17 = smov %s4230_s18 }
0x1563   : > { %s5042_s18 = smov %s4234_s19  ;;  %s5043_s19 = smov %s4348_s26 }
0x1564   : > { %s5044_s20 = smov %s4337_s23  ;;  %23 = sbr.rel (!%p21_p2) target bundleno = 5 (0x5), region = 113 }
0x1569   :  { %3529 = vsyncpa [#allocation3], 1 }
0x156a   :  { %3531 = vsyncpa [#allocation3 + $0x1], 1 }

</bundles_post_ra>
